<compile_context>
chip_gen: v5e
topology: v5e:2x2
jax: 0.10.0
libtpu: 0.0.40
codegen_flags: <defaults>
</compile_context>

<pallas_src>
import functools

import jax
import jax.numpy as jnp
from jax.experimental import pallas as pl
from jax.experimental.pallas import tpu as pltpu


def lstm_fc_kernel(x_ref,
                   wih0_ref, whh0_ref, b0_ref,
                   wih1_ref, whh1_ref, b1_ref,
                   fcw_ref, fcb_ref,
                   out_ref,
                   *, hidden_size, batch, seq_len):
    """2-layer LSTM (wave-pipelined) over the whole sequence + final Linear.

    Shapes (single program, no grid, everything resident in VMEM):
      x_ref    : (T*B, I)  f32   time-major flattened input
      wih0_ref : (I, 4H)   bf16        b0_ref : (1, 4H) f32
      whh0_ref : (4H, 4H)  bf16  W_hh0 in rows [3H:4H), zeros elsewhere
      wih1_ref : (4H, 4H)  bf16  W_ih1 in rows [3H:4H), zeros elsewhere
      whh1_ref : (4H, 4H)  bf16  W_hh1 in rows [3H:4H), zeros elsewhere
      b1_ref   : (1, 4H)   f32
      fcw_ref  : (4H, O)   bf16  W_fc  in rows [3H:4H), zeros elsewhere
      fcb_ref  : (1, O)    f32
      out_ref  : (B, O)    f32
    """
    H, B, T = hidden_size, batch, seq_len
    G = 4 * H

    # Hoisted constant vregs (broadcast_in_dim is not CSE'd -> build them once).
    lane = jax.lax.broadcasted_iota(jnp.int32, (B, G), 1)
    g_mask = (lane >= 2 * H) & (lane < 3 * H)          # gate block g -> tanh
    scale = jnp.where(g_mask, 1.0, 0.5).astype(jnp.float32)
    offset = jnp.where(g_mask, 0.0, 0.5).astype(jnp.float32)

    def lstm_step(gates, c_prev):
        """One LSTM cell update in wide-lane form.

        gates  : (B, 4H) f32, gate blocks [i, f, g, o]
        c_prev : (B, 4H) f32 with the real cell state in lane block 3, or None
        returns (h_new, c_new), both wide with the real values in block 3.
        """
        # One fused EUP tanh covers sigmoid(i,f,o) and tanh(g).
        act = scale * jnp.tanh(gates * scale) + offset      # [i, f, g, o]
        r2 = pltpu.roll(act, 2 * H, 1)                      # [g, o, i, f]
        ig = pltpu.roll(act * r2, H, 1)                     # i*g in blocks 1, 3
        # block 3: c_new = f*c_prev + i*g   (f sits in block 3 of r2)
        c_new = ig if c_prev is None else r2 * c_prev + ig
        # block 3: h_new = o * tanh(c_new)  (o sits in block 3 of act)
        h_new = act * jnp.tanh(c_new)
        return h_new, c_new

    def bdot(h, w):
        # bf16 x bf16 MXU matmul, f32 accumulation.
        return jnp.dot(h.astype(jnp.bfloat16), w,
                       preferred_element_type=jnp.float32)

    # ---- Layer-0 input projection, hoisted over all timesteps at once. ----
    gx0 = jnp.dot(x_ref[...].astype(jnp.bfloat16), wih0_ref[...],
                  preferred_element_type=jnp.float32) + b0_ref[...]

    whh0 = whh0_ref[...]
    wih1 = wih1_ref[...]
    whh1 = whh1_ref[...]
    b1 = b1_ref[...]

    # ---- Prologue: layer-0 step 0. ----
    h0, c0 = lstm_step(gx0[0:B, :], None)

    # ---- Wave pipeline: layer-0 step t || layer-1 step t-1 (independent). ----
    h1, c1 = None, None
    for t in range(1, T):
        g0 = gx0[t * B:(t + 1) * B, :] + bdot(h0, whh0)
        g1 = bdot(h0, wih1) + b1                 # wih1 rows annihilate garbage
        if h1 is not None:
            g1 = g1 + bdot(h1, whh1)
        h0_new, c0 = lstm_step(g0, c0)
        h1, c1 = lstm_step(g1, c1)
        h0 = h0_new

    # ---- Epilogue: layer-1 step T-1. ----
    g1 = bdot(h0, wih1) + b1
    if h1 is not None:
        g1 = g1 + bdot(h1, whh1)
    h1, _ = lstm_step(g1, c1)

    # ---- fc on the last timestep of the last layer. ----
    out = jnp.dot(h1.astype(jnp.bfloat16), fcw_ref[...],
                  preferred_element_type=jnp.float32) + fcb_ref[...]
    out_ref[...] = out.astype(out_ref.dtype)


def pack_params(params, *, hidden_size):
    """One-time packing: widen + cast weights to bf16 (kernel-ready pytree)."""
    (wih0, whh0, b0, wih1, whh1, b1, fcw, fcb) = params
    H = hidden_size

    def widen(w):
        # Place an (H, N) weight into rows [3H:4H) of a zero (4H, N) matrix so
        # the wide (B, 4H) state (real h/c in the last lane block) feeds the MXU
        # without ever slicing lanes.
        z = jnp.zeros((4 * H, w.shape[1]), jnp.float32)
        return z.at[3 * H:, :].set(w).astype(jnp.bfloat16)

    return (wih0.astype(jnp.bfloat16), widen(whh0), b0,
            widen(wih1), widen(whh1), b1,
            widen(fcw), fcb)


def lstm_model_forward(x, packed_params, *, hidden_size, output_size):
    """Flattens x time-major and invokes the Pallas kernel (single program)."""
    B, T, I = x.shape
    x_flat = jnp.transpose(x, (1, 0, 2)).reshape(T * B, I)   # row = t*B + b

    vmem = pl.BlockSpec(memory_space=pltpu.MemorySpace.VMEM)
    kernel = functools.partial(lstm_fc_kernel,
                               hidden_size=hidden_size, batch=B, seq_len=T)

    return pl.pallas_call(
        kernel,
        out_shape=jax.ShapeDtypeStruct((B, output_size), jnp.float32),
        in_specs=[vmem] * 9,
        out_specs=vmem,
    )(x_flat, *packed_params)


def make_params(key, input_size, hidden_size, num_layers, output_size):
    """Deterministic param init mirroring torch.nn.LSTM/Linear shapes.

    Weights are stored pre-transposed: (in_dim, 4H) / (H, 4H) / (H, O).
    The two LSTM biases (b_ih + b_hh) are pre-summed into one (1, 4H) row.
    """
    assert num_layers == 2, "kernel is specialized for num_layers=2"
    H = hidden_size
    k = 1.0 / jnp.sqrt(jnp.float32(H))
    keys = jax.random.split(key, 10)

    def u(kk, shape):
        return jax.random.uniform(kk, shape, jnp.float32, minval=-k, maxval=k)

    wih0 = u(keys[0], (input_size, 4 * H))
    whh0 = u(keys[1], (H, 4 * H))
    b0 = u(keys[2], (1, 4 * H)) + u(keys[3], (1, 4 * H))
    wih1 = u(keys[4], (H, 4 * H))
    whh1 = u(keys[5], (H, 4 * H))
    b1 = u(keys[6], (1, 4 * H)) + u(keys[7], (1, 4 * H))
    fcw = u(keys[8], (H, output_size))
    fcb = u(keys[9], (1, output_size))
    return (wih0, whh0, b0, wih1, whh1, b1, fcw, fcb)


def reference_forward(x, params, *, hidden_size, round_weights_to_bf16=True):
    """Pure-JAX reference implementing the PyTorch LSTM semantics in f32.

    With round_weights_to_bf16=True the weights are rounded to bf16 exactly as
    the kernel stores them, so the comparison isolates kernel structure from
    weight-storage precision.
    """
    (wih0, whh0, b0, wih1, whh1, b1, fcw, fcb) = params

    def r(w):
        if round_weights_to_bf16:
            return w.astype(jnp.bfloat16).astype(jnp.float32)
        return w

    H = hidden_size
    B, T, _ = x.shape
    seq = x.astype(jnp.float32)

    for (w_ih, w_hh, bias) in [(r(wih0), r(whh0), b0), (r(wih1), r(whh1), b1)]:
        h = jnp.zeros((B, H), jnp.float32)
        c = jnp.zeros((B, H), jnp.float32)
        outs = []
        for t in range(T):
            gates = seq[:, t, :] @ w_ih + h @ w_hh + bias
            i_g = jax.nn.sigmoid(gates[:, 0 * H:1 * H])
            f_g = jax.nn.sigmoid(gates[:, 1 * H:2 * H])
            g_g = jnp.tanh(gates[:, 2 * H:3 * H])
            o_g = jax.nn.sigmoid(gates[:, 3 * H:4 * H])
            c = f_g * c + i_g * g_g
            h = o_g * jnp.tanh(c)
            outs.append(h)
        seq = jnp.stack(outs, axis=1)

    return seq[:, -1, :] @ r(fcw) + fcb


if __name__ == "__main__":
    # Small shapes consistent with the module's forward (batch_first LSTM).
    batch, seq_len = 2, 8
    input_size, hidden_size, num_layers, output_size = 16, 32, 2, 8

    key = jax.random.PRNGKey(0)
    kx, kp = jax.random.split(key)
    x = jax.random.normal(kx, (batch, seq_len, input_size), jnp.float32)
    params = make_params(kp, input_size, hidden_size, num_layers, output_size)
    packed = pack_params(params, hidden_size=hidden_size)

    fwd = jax.jit(functools.partial(lstm_model_forward,
                                    hidden_size=hidden_size,
                                    output_size=output_size))
    out = jax.block_until_ready(fwd(x, packed))

    ref = reference_forward(x, params, hidden_size=hidden_size)
    assert out.shape == (batch, output_size)
    assert jnp.allclose(out, ref, atol=2e-2, rtol=2e-2), "mismatch vs reference"

    print("KERNEL_OK")
</pallas_src>

<mosaic_0001>
module attributes {stable_mosaic.version = 11 : i64} {
  func.func @lstm_fc_kernel(%arg0: memref<16x16xf32, #tpu.memory_space<vmem>>, %arg1: memref<16x128xbf16, #tpu.memory_space<vmem>>, %arg2: memref<128x128xbf16, #tpu.memory_space<vmem>>, %arg3: memref<1x128xf32, #tpu.memory_space<vmem>>, %arg4: memref<128x128xbf16, #tpu.memory_space<vmem>>, %arg5: memref<128x128xbf16, #tpu.memory_space<vmem>>, %arg6: memref<1x128xf32, #tpu.memory_space<vmem>>, %arg7: memref<128x8xbf16, #tpu.memory_space<vmem>>, %arg8: memref<1x8xf32, #tpu.memory_space<vmem>>, %arg9: memref<2x8xf32, #tpu.memory_space<vmem>>) attributes {dimension_semantics = [], scalar_prefetch = 0 : i64, scratch_operands = 0 : i64, tpu.core_type = #tpu.core_type<tc>} {
    %0 = tpu.iota {dimensions = array<i32: 1>} : vector<2x128xi32>
    %c64_i32 = arith.constant 64 : i32
    %1 = vector.broadcast %c64_i32 : i32 to vector<2x128xi32>
    %2 = arith.cmpi sge, %0, %1 : vector<2x128xi32>
    %c96_i32 = arith.constant 96 : i32
    %3 = vector.broadcast %c96_i32 : i32 to vector<2x128xi32>
    %4 = arith.cmpi slt, %0, %3 : vector<2x128xi32>
    %5 = arith.andi %2, %4 : vector<2x128xi1>
    %cst = arith.constant 1.000000e+00 : f32
    %cst_0 = arith.constant 5.000000e-01 : f32
    %6 = vector.broadcast %cst : f32 to vector<2x128xf32>
    %7 = vector.broadcast %cst_0 : f32 to vector<2x128xf32>
    %8 = arith.select %5, %6, %7 : vector<2x128xi1>, vector<2x128xf32>
    %cst_1 = arith.constant 0.000000e+00 : f32
    %cst_2 = arith.constant 5.000000e-01 : f32
    %9 = vector.broadcast %cst_1 : f32 to vector<2x128xf32>
    %10 = vector.broadcast %cst_2 : f32 to vector<2x128xf32>
    %11 = arith.select %5, %9, %10 : vector<2x128xi1>, vector<2x128xf32>
    %c0 = arith.constant 0 : index
    %c0_3 = arith.constant 0 : index
    %12 = vector.load %arg0[%c0, %c0_3] : memref<16x16xf32, #tpu.memory_space<vmem>>, vector<16x16xf32>
    %13 = arith.truncf %12 : vector<16x16xf32> to vector<16x16xbf16>
    %c0_4 = arith.constant 0 : index
    %c0_5 = arith.constant 0 : index
    %14 = vector.load %arg1[%c0_4, %c0_5] : memref<16x128xbf16, #tpu.memory_space<vmem>>, vector<16x128xbf16>
    %cst_6 = arith.constant dense<0.000000e+00> : vector<16x128xf32>
    %15 = tpu.matmul %13, %14, %cst_6 {dimension_numbers = #tpu.dot_dimension_numbers<[1], [0], [0], [1], [0, 0, 1, 1], [], []>} : vector<16x16xbf16>, vector<16x128xbf16>, vector<16x128xf32> -> vector<16x128xf32>
    %c0_7 = arith.constant 0 : index
    %c0_8 = arith.constant 0 : index
    %16 = vector.load %arg3[%c0_7, %c0_8] : memref<1x128xf32, #tpu.memory_space<vmem>>, vector<1x128xf32>
    %17 = vector.broadcast %16 : vector<1x128xf32> to vector<16x128xf32>
    %18 = arith.addf %15, %17 : vector<16x128xf32>
    %c0_9 = arith.constant 0 : index
    %c0_10 = arith.constant 0 : index
    %19 = vector.load %arg2[%c0_9, %c0_10] : memref<128x128xbf16, #tpu.memory_space<vmem>>, vector<128x128xbf16>
    %c0_11 = arith.constant 0 : index
    %c0_12 = arith.constant 0 : index
    %20 = vector.load %arg4[%c0_11, %c0_12] : memref<128x128xbf16, #tpu.memory_space<vmem>>, vector<128x128xbf16>
    %c0_13 = arith.constant 0 : index
    %c0_14 = arith.constant 0 : index
    %21 = vector.load %arg5[%c0_13, %c0_14] : memref<128x128xbf16, #tpu.memory_space<vmem>>, vector<128x128xbf16>
    %c0_15 = arith.constant 0 : index
    %c0_16 = arith.constant 0 : index
    %22 = vector.load %arg6[%c0_15, %c0_16] : memref<1x128xf32, #tpu.memory_space<vmem>>, vector<1x128xf32>
    %23 = vector.extract_strided_slice %18 {offsets = [0, 0], sizes = [2, 128], strides = [1, 1]} : vector<16x128xf32> to vector<2x128xf32>
    %24 = arith.mulf %23, %8 : vector<2x128xf32>
    %25 = math.tanh %24 : vector<2x128xf32>
    %26 = arith.mulf %8, %25 : vector<2x128xf32>
    %27 = arith.addf %26, %11 : vector<2x128xf32>
    %c64_i32_17 = arith.constant 64 : i32
    %28 = tpu.dynamic_rotate %27 by %c64_i32_17 dim 1 : vector<2x128xf32>, i32 -> vector<2x128xf32>
    %29 = arith.mulf %27, %28 : vector<2x128xf32>
    %c32_i32 = arith.constant 32 : i32
    %30 = tpu.dynamic_rotate %29 by %c32_i32 dim 1 : vector<2x128xf32>, i32 -> vector<2x128xf32>
    %31 = math.tanh %30 : vector<2x128xf32>
    %32 = arith.mulf %27, %31 : vector<2x128xf32>
    %33 = vector.extract_strided_slice %18 {offsets = [2, 0], sizes = [2, 128], strides = [1, 1]} : vector<16x128xf32> to vector<2x128xf32>
    %34 = arith.truncf %32 : vector<2x128xf32> to vector<2x128xbf16>
    %cst_18 = arith.constant dense<0.000000e+00> : vector<2x128xf32>
    %35 = tpu.matmul %34, %19, %cst_18 {dimension_numbers = #tpu.dot_dimension_numbers<[1], [0], [0], [1], [0, 0, 1, 1], [], []>} : vector<2x128xbf16>, vector<128x128xbf16>, vector<2x128xf32> -> vector<2x128xf32>
    %36 = arith.addf %33, %35 : vector<2x128xf32>
    %37 = arith.truncf %32 : vector<2x128xf32> to vector<2x128xbf16>
    %cst_19 = arith.constant dense<0.000000e+00> : vector<2x128xf32>
    %38 = tpu.matmul %37, %20, %cst_19 {dimension_numbers = #tpu.dot_dimension_numbers<[1], [0], [0], [1], [0, 0, 1, 1], [], []>} : vector<2x128xbf16>, vector<128x128xbf16>, vector<2x128xf32> -> vector<2x128xf32>
    %39 = vector.broadcast %22 : vector<1x128xf32> to vector<2x128xf32>
    %40 = arith.addf %38, %39 : vector<2x128xf32>
    %41 = arith.mulf %36, %8 : vector<2x128xf32>
    %42 = math.tanh %41 : vector<2x128xf32>
    %43 = arith.mulf %8, %42 : vector<2x128xf32>
    %44 = arith.addf %43, %11 : vector<2x128xf32>
    %c64_i32_20 = arith.constant 64 : i32
    %45 = tpu.dynamic_rotate %44 by %c64_i32_20 dim 1 : vector<2x128xf32>, i32 -> vector<2x128xf32>
    %46 = arith.mulf %44, %45 : vector<2x128xf32>
    %c32_i32_21 = arith.constant 32 : i32
    %47 = tpu.dynamic_rotate %46 by %c32_i32_21 dim 1 : vector<2x128xf32>, i32 -> vector<2x128xf32>
    %48 = arith.mulf %45, %30 : vector<2x128xf32>
    %49 = arith.addf %48, %47 : vector<2x128xf32>
    %50 = math.tanh %49 : vector<2x128xf32>
    %51 = arith.mulf %44, %50 : vector<2x128xf32>
    %52 = arith.mulf %40, %8 : vector<2x128xf32>
    %53 = math.tanh %52 : vector<2x128xf32>
    %54 = arith.mulf %8, %53 : vector<2x128xf32>
    %55 = arith.addf %54, %11 : vector<2x128xf32>
    %c64_i32_22 = arith.constant 64 : i32
    %56 = tpu.dynamic_rotate %55 by %c64_i32_22 dim 1 : vector<2x128xf32>, i32 -> vector<2x128xf32>
    %57 = arith.mulf %55, %56 : vector<2x128xf32>
    %c32_i32_23 = arith.constant 32 : i32
    %58 = tpu.dynamic_rotate %57 by %c32_i32_23 dim 1 : vector<2x128xf32>, i32 -> vector<2x128xf32>
    %59 = math.tanh %58 : vector<2x128xf32>
    %60 = arith.mulf %55, %59 : vector<2x128xf32>
    %61 = vector.extract_strided_slice %18 {offsets = [4, 0], sizes = [2, 128], strides = [1, 1]} : vector<16x128xf32> to vector<2x128xf32>
    %62 = arith.truncf %51 : vector<2x128xf32> to vector<2x128xbf16>
    %cst_24 = arith.constant dense<0.000000e+00> : vector<2x128xf32>
    %63 = tpu.matmul %62, %19, %cst_24 {dimension_numbers = #tpu.dot_dimension_numbers<[1], [0], [0], [1], [0, 0, 1, 1], [], []>} : vector<2x128xbf16>, vector<128x128xbf16>, vector<2x128xf32> -> vector<2x128xf32>
    %64 = arith.addf %61, %63 : vector<2x128xf32>
    %65 = arith.truncf %51 : vector<2x128xf32> to vector<2x128xbf16>
    %cst_25 = arith.constant dense<0.000000e+00> : vector<2x128xf32>
    %66 = tpu.matmul %65, %20, %cst_25 {dimension_numbers = #tpu.dot_dimension_numbers<[1], [0], [0], [1], [0, 0, 1, 1], [], []>} : vector<2x128xbf16>, vector<128x128xbf16>, vector<2x128xf32> -> vector<2x128xf32>
    %67 = vector.broadcast %22 : vector<1x128xf32> to vector<2x128xf32>
    %68 = arith.addf %66, %67 : vector<2x128xf32>
    %69 = arith.truncf %60 : vector<2x128xf32> to vector<2x128xbf16>
    %cst_26 = arith.constant dense<0.000000e+00> : vector<2x128xf32>
    %70 = tpu.matmul %69, %21, %cst_26 {dimension_numbers = #tpu.dot_dimension_numbers<[1], [0], [0], [1], [0, 0, 1, 1], [], []>} : vector<2x128xbf16>, vector<128x128xbf16>, vector<2x128xf32> -> vector<2x128xf32>
    %71 = arith.addf %68, %70 : vector<2x128xf32>
    %72 = arith.mulf %64, %8 : vector<2x128xf32>
    %73 = math.tanh %72 : vector<2x128xf32>
    %74 = arith.mulf %8, %73 : vector<2x128xf32>
    %75 = arith.addf %74, %11 : vector<2x128xf32>
    %c64_i32_27 = arith.constant 64 : i32
    %76 = tpu.dynamic_rotate %75 by %c64_i32_27 dim 1 : vector<2x128xf32>, i32 -> vector<2x128xf32>
    %77 = arith.mulf %75, %76 : vector<2x128xf32>
    %c32_i32_28 = arith.constant 32 : i32
    %78 = tpu.dynamic_rotate %77 by %c32_i32_28 dim 1 : vector<2x128xf32>, i32 -> vector<2x128xf32>
    %79 = arith.mulf %76, %49 : vector<2x128xf32>
    %80 = arith.addf %79, %78 : vector<2x128xf32>
    %81 = math.tanh %80 : vector<2x128xf32>
    %82 = arith.mulf %75, %81 : vector<2x128xf32>
    %83 = arith.mulf %71, %8 : vector<2x128xf32>
    %84 = math.tanh %83 : vector<2x128xf32>
    %85 = arith.mulf %8, %84 : vector<2x128xf32>
    %86 = arith.addf %85, %11 : vector<2x128xf32>
    %c64_i32_29 = arith.constant 64 : i32
    %87 = tpu.dynamic_rotate %86 by %c64_i32_29 dim 1 : vector<2x128xf32>, i32 -> vector<2x128xf32>
    %88 = arith.mulf %86, %87 : vector<2x128xf32>
    %c32_i32_30 = arith.constant 32 : i32
    %89 = tpu.dynamic_rotate %88 by %c32_i32_30 dim 1 : vector<2x128xf32>, i32 -> vector<2x128xf32>
    %90 = arith.mulf %87, %58 : vector<2x128xf32>
    %91 = arith.addf %90, %89 : vector<2x128xf32>
    %92 = math.tanh %91 : vector<2x128xf32>
    %93 = arith.mulf %86, %92 : vector<2x128xf32>
    %94 = vector.extract_strided_slice %18 {offsets = [6, 0], sizes = [2, 128], strides = [1, 1]} : vector<16x128xf32> to vector<2x128xf32>
    %95 = arith.truncf %82 : vector<2x128xf32> to vector<2x128xbf16>
    %cst_31 = arith.constant dense<0.000000e+00> : vector<2x128xf32>
    %96 = tpu.matmul %95, %19, %cst_31 {dimension_numbers = #tpu.dot_dimension_numbers<[1], [0], [0], [1], [0, 0, 1, 1], [], []>} : vector<2x128xbf16>, vector<128x128xbf16>, vector<2x128xf32> -> vector<2x128xf32>
    %97 = arith.addf %94, %96 : vector<2x128xf32>
    %98 = arith.truncf %82 : vector<2x128xf32> to vector<2x128xbf16>
    %cst_32 = arith.constant dense<0.000000e+00> : vector<2x128xf32>
    %99 = tpu.matmul %98, %20, %cst_32 {dimension_numbers = #tpu.dot_dimension_numbers<[1], [0], [0], [1], [0, 0, 1, 1], [], []>} : vector<2x128xbf16>, vector<128x128xbf16>, vector<2x128xf32> -> vector<2x128xf32>
    %100 = vector.broadcast %22 : vector<1x128xf32> to vector<2x128xf32>
    %101 = arith.addf %99, %100 : vector<2x128xf32>
    %102 = arith.truncf %93 : vector<2x128xf32> to vector<2x128xbf16>
    %cst_33 = arith.constant dense<0.000000e+00> : vector<2x128xf32>
    %103 = tpu.matmul %102, %21, %cst_33 {dimension_numbers = #tpu.dot_dimension_numbers<[1], [0], [0], [1], [0, 0, 1, 1], [], []>} : vector<2x128xbf16>, vector<128x128xbf16>, vector<2x128xf32> -> vector<2x128xf32>
    %104 = arith.addf %101, %103 : vector<2x128xf32>
    %105 = arith.mulf %97, %8 : vector<2x128xf32>
    %106 = math.tanh %105 : vector<2x128xf32>
    %107 = arith.mulf %8, %106 : vector<2x128xf32>
    %108 = arith.addf %107, %11 : vector<2x128xf32>
    %c64_i32_34 = arith.constant 64 : i32
    %109 = tpu.dynamic_rotate %108 by %c64_i32_34 dim 1 : vector<2x128xf32>, i32 -> vector<2x128xf32>
    %110 = arith.mulf %108, %109 : vector<2x128xf32>
    %c32_i32_35 = arith.constant 32 : i32
    %111 = tpu.dynamic_rotate %110 by %c32_i32_35 dim 1 : vector<2x128xf32>, i32 -> vector<2x128xf32>
    %112 = arith.mulf %109, %80 : vector<2x128xf32>
    %113 = arith.addf %112, %111 : vector<2x128xf32>
    %114 = math.tanh %113 : vector<2x128xf32>
    %115 = arith.mulf %108, %114 : vector<2x128xf32>
    %116 = arith.mulf %104, %8 : vector<2x128xf32>
    %117 = math.tanh %116 : vector<2x128xf32>
    %118 = arith.mulf %8, %117 : vector<2x128xf32>
    %119 = arith.addf %118, %11 : vector<2x128xf32>
    %c64_i32_36 = arith.constant 64 : i32
    %120 = tpu.dynamic_rotate %119 by %c64_i32_36 dim 1 : vector<2x128xf32>, i32 -> vector<2x128xf32>
    %121 = arith.mulf %119, %120 : vector<2x128xf32>
    %c32_i32_37 = arith.constant 32 : i32
    %122 = tpu.dynamic_rotate %121 by %c32_i32_37 dim 1 : vector<2x128xf32>, i32 -> vector<2x128xf32>
    %123 = arith.mulf %120, %91 : vector<2x128xf32>
    %124 = arith.addf %123, %122 : vector<2x128xf32>
    %125 = math.tanh %124 : vector<2x128xf32>
    %126 = arith.mulf %119, %125 : vector<2x128xf32>
    %127 = vector.extract_strided_slice %18 {offsets = [8, 0], sizes = [2, 128], strides = [1, 1]} : vector<16x128xf32> to vector<2x128xf32>
    %128 = arith.truncf %115 : vector<2x128xf32> to vector<2x128xbf16>
    %cst_38 = arith.constant dense<0.000000e+00> : vector<2x128xf32>
    %129 = tpu.matmul %128, %19, %cst_38 {dimension_numbers = #tpu.dot_dimension_numbers<[1], [0], [0], [1], [0, 0, 1, 1], [], []>} : vector<2x128xbf16>, vector<128x128xbf16>, vector<2x128xf32> -> vector<2x128xf32>
    %130 = arith.addf %127, %129 : vector<2x128xf32>
    %131 = arith.truncf %115 : vector<2x128xf32> to vector<2x128xbf16>
    %cst_39 = arith.constant dense<0.000000e+00> : vector<2x128xf32>
    %132 = tpu.matmul %131, %20, %cst_39 {dimension_numbers = #tpu.dot_dimension_numbers<[1], [0], [0], [1], [0, 0, 1, 1], [], []>} : vector<2x128xbf16>, vector<128x128xbf16>, vector<2x128xf32> -> vector<2x128xf32>
    %133 = vector.broadcast %22 : vector<1x128xf32> to vector<2x128xf32>
    %134 = arith.addf %132, %133 : vector<2x128xf32>
    %135 = arith.truncf %126 : vector<2x128xf32> to vector<2x128xbf16>
    %cst_40 = arith.constant dense<0.000000e+00> : vector<2x128xf32>
    %136 = tpu.matmul %135, %21, %cst_40 {dimension_numbers = #tpu.dot_dimension_numbers<[1], [0], [0], [1], [0, 0, 1, 1], [], []>} : vector<2x128xbf16>, vector<128x128xbf16>, vector<2x128xf32> -> vector<2x128xf32>
    %137 = arith.addf %134, %136 : vector<2x128xf32>
    %138 = arith.mulf %130, %8 : vector<2x128xf32>
    %139 = math.tanh %138 : vector<2x128xf32>
    %140 = arith.mulf %8, %139 : vector<2x128xf32>
    %141 = arith.addf %140, %11 : vector<2x128xf32>
    %c64_i32_41 = arith.constant 64 : i32
    %142 = tpu.dynamic_rotate %141 by %c64_i32_41 dim 1 : vector<2x128xf32>, i32 -> vector<2x128xf32>
    %143 = arith.mulf %141, %142 : vector<2x128xf32>
    %c32_i32_42 = arith.constant 32 : i32
    %144 = tpu.dynamic_rotate %143 by %c32_i32_42 dim 1 : vector<2x128xf32>, i32 -> vector<2x128xf32>
    %145 = arith.mulf %142, %113 : vector<2x128xf32>
    %146 = arith.addf %145, %144 : vector<2x128xf32>
    %147 = math.tanh %146 : vector<2x128xf32>
    %148 = arith.mulf %141, %147 : vector<2x128xf32>
    %149 = arith.mulf %137, %8 : vector<2x128xf32>
    %150 = math.tanh %149 : vector<2x128xf32>
    %151 = arith.mulf %8, %150 : vector<2x128xf32>
    %152 = arith.addf %151, %11 : vector<2x128xf32>
    %c64_i32_43 = arith.constant 64 : i32
    %153 = tpu.dynamic_rotate %152 by %c64_i32_43 dim 1 : vector<2x128xf32>, i32 -> vector<2x128xf32>
    %154 = arith.mulf %152, %153 : vector<2x128xf32>
    %c32_i32_44 = arith.constant 32 : i32
    %155 = tpu.dynamic_rotate %154 by %c32_i32_44 dim 1 : vector<2x128xf32>, i32 -> vector<2x128xf32>
    %156 = arith.mulf %153, %124 : vector<2x128xf32>
    %157 = arith.addf %156, %155 : vector<2x128xf32>
    %158 = math.tanh %157 : vector<2x128xf32>
    %159 = arith.mulf %152, %158 : vector<2x128xf32>
    %160 = vector.extract_strided_slice %18 {offsets = [10, 0], sizes = [2, 128], strides = [1, 1]} : vector<16x128xf32> to vector<2x128xf32>
    %161 = arith.truncf %148 : vector<2x128xf32> to vector<2x128xbf16>
    %cst_45 = arith.constant dense<0.000000e+00> : vector<2x128xf32>
    %162 = tpu.matmul %161, %19, %cst_45 {dimension_numbers = #tpu.dot_dimension_numbers<[1], [0], [0], [1], [0, 0, 1, 1], [], []>} : vector<2x128xbf16>, vector<128x128xbf16>, vector<2x128xf32> -> vector<2x128xf32>
    %163 = arith.addf %160, %162 : vector<2x128xf32>
    %164 = arith.truncf %148 : vector<2x128xf32> to vector<2x128xbf16>
    %cst_46 = arith.constant dense<0.000000e+00> : vector<2x128xf32>
    %165 = tpu.matmul %164, %20, %cst_46 {dimension_numbers = #tpu.dot_dimension_numbers<[1], [0], [0], [1], [0, 0, 1, 1], [], []>} : vector<2x128xbf16>, vector<128x128xbf16>, vector<2x128xf32> -> vector<2x128xf32>
    %166 = vector.broadcast %22 : vector<1x128xf32> to vector<2x128xf32>
    %167 = arith.addf %165, %166 : vector<2x128xf32>
    %168 = arith.truncf %159 : vector<2x128xf32> to vector<2x128xbf16>
    %cst_47 = arith.constant dense<0.000000e+00> : vector<2x128xf32>
    %169 = tpu.matmul %168, %21, %cst_47 {dimension_numbers = #tpu.dot_dimension_numbers<[1], [0], [0], [1], [0, 0, 1, 1], [], []>} : vector<2x128xbf16>, vector<128x128xbf16>, vector<2x128xf32> -> vector<2x128xf32>
    %170 = arith.addf %167, %169 : vector<2x128xf32>
    %171 = arith.mulf %163, %8 : vector<2x128xf32>
    %172 = math.tanh %171 : vector<2x128xf32>
    %173 = arith.mulf %8, %172 : vector<2x128xf32>
    %174 = arith.addf %173, %11 : vector<2x128xf32>
    %c64_i32_48 = arith.constant 64 : i32
    %175 = tpu.dynamic_rotate %174 by %c64_i32_48 dim 1 : vector<2x128xf32>, i32 -> vector<2x128xf32>
    %176 = arith.mulf %174, %175 : vector<2x128xf32>
    %c32_i32_49 = arith.constant 32 : i32
    %177 = tpu.dynamic_rotate %176 by %c32_i32_49 dim 1 : vector<2x128xf32>, i32 -> vector<2x128xf32>
    %178 = arith.mulf %175, %146 : vector<2x128xf32>
    %179 = arith.addf %178, %177 : vector<2x128xf32>
    %180 = math.tanh %179 : vector<2x128xf32>
    %181 = arith.mulf %174, %180 : vector<2x128xf32>
    %182 = arith.mulf %170, %8 : vector<2x128xf32>
    %183 = math.tanh %182 : vector<2x128xf32>
    %184 = arith.mulf %8, %183 : vector<2x128xf32>
    %185 = arith.addf %184, %11 : vector<2x128xf32>
    %c64_i32_50 = arith.constant 64 : i32
    %186 = tpu.dynamic_rotate %185 by %c64_i32_50 dim 1 : vector<2x128xf32>, i32 -> vector<2x128xf32>
    %187 = arith.mulf %185, %186 : vector<2x128xf32>
    %c32_i32_51 = arith.constant 32 : i32
    %188 = tpu.dynamic_rotate %187 by %c32_i32_51 dim 1 : vector<2x128xf32>, i32 -> vector<2x128xf32>
    %189 = arith.mulf %186, %157 : vector<2x128xf32>
    %190 = arith.addf %189, %188 : vector<2x128xf32>
    %191 = math.tanh %190 : vector<2x128xf32>
    %192 = arith.mulf %185, %191 : vector<2x128xf32>
    %193 = vector.extract_strided_slice %18 {offsets = [12, 0], sizes = [2, 128], strides = [1, 1]} : vector<16x128xf32> to vector<2x128xf32>
    %194 = arith.truncf %181 : vector<2x128xf32> to vector<2x128xbf16>
    %cst_52 = arith.constant dense<0.000000e+00> : vector<2x128xf32>
    %195 = tpu.matmul %194, %19, %cst_52 {dimension_numbers = #tpu.dot_dimension_numbers<[1], [0], [0], [1], [0, 0, 1, 1], [], []>} : vector<2x128xbf16>, vector<128x128xbf16>, vector<2x128xf32> -> vector<2x128xf32>
    %196 = arith.addf %193, %195 : vector<2x128xf32>
    %197 = arith.truncf %181 : vector<2x128xf32> to vector<2x128xbf16>
    %cst_53 = arith.constant dense<0.000000e+00> : vector<2x128xf32>
    %198 = tpu.matmul %197, %20, %cst_53 {dimension_numbers = #tpu.dot_dimension_numbers<[1], [0], [0], [1], [0, 0, 1, 1], [], []>} : vector<2x128xbf16>, vector<128x128xbf16>, vector<2x128xf32> -> vector<2x128xf32>
    %199 = vector.broadcast %22 : vector<1x128xf32> to vector<2x128xf32>
    %200 = arith.addf %198, %199 : vector<2x128xf32>
    %201 = arith.truncf %192 : vector<2x128xf32> to vector<2x128xbf16>
    %cst_54 = arith.constant dense<0.000000e+00> : vector<2x128xf32>
    %202 = tpu.matmul %201, %21, %cst_54 {dimension_numbers = #tpu.dot_dimension_numbers<[1], [0], [0], [1], [0, 0, 1, 1], [], []>} : vector<2x128xbf16>, vector<128x128xbf16>, vector<2x128xf32> -> vector<2x128xf32>
    %203 = arith.addf %200, %202 : vector<2x128xf32>
    %204 = arith.mulf %196, %8 : vector<2x128xf32>
    %205 = math.tanh %204 : vector<2x128xf32>
    %206 = arith.mulf %8, %205 : vector<2x128xf32>
    %207 = arith.addf %206, %11 : vector<2x128xf32>
    %c64_i32_55 = arith.constant 64 : i32
    %208 = tpu.dynamic_rotate %207 by %c64_i32_55 dim 1 : vector<2x128xf32>, i32 -> vector<2x128xf32>
    %209 = arith.mulf %207, %208 : vector<2x128xf32>
    %c32_i32_56 = arith.constant 32 : i32
    %210 = tpu.dynamic_rotate %209 by %c32_i32_56 dim 1 : vector<2x128xf32>, i32 -> vector<2x128xf32>
    %211 = arith.mulf %208, %179 : vector<2x128xf32>
    %212 = arith.addf %211, %210 : vector<2x128xf32>
    %213 = math.tanh %212 : vector<2x128xf32>
    %214 = arith.mulf %207, %213 : vector<2x128xf32>
    %215 = arith.mulf %203, %8 : vector<2x128xf32>
    %216 = math.tanh %215 : vector<2x128xf32>
    %217 = arith.mulf %8, %216 : vector<2x128xf32>
    %218 = arith.addf %217, %11 : vector<2x128xf32>
    %c64_i32_57 = arith.constant 64 : i32
    %219 = tpu.dynamic_rotate %218 by %c64_i32_57 dim 1 : vector<2x128xf32>, i32 -> vector<2x128xf32>
    %220 = arith.mulf %218, %219 : vector<2x128xf32>
    %c32_i32_58 = arith.constant 32 : i32
    %221 = tpu.dynamic_rotate %220 by %c32_i32_58 dim 1 : vector<2x128xf32>, i32 -> vector<2x128xf32>
    %222 = arith.mulf %219, %190 : vector<2x128xf32>
    %223 = arith.addf %222, %221 : vector<2x128xf32>
    %224 = math.tanh %223 : vector<2x128xf32>
    %225 = arith.mulf %218, %224 : vector<2x128xf32>
    %226 = vector.extract_strided_slice %18 {offsets = [14, 0], sizes = [2, 128], strides = [1, 1]} : vector<16x128xf32> to vector<2x128xf32>
    %227 = arith.truncf %214 : vector<2x128xf32> to vector<2x128xbf16>
    %cst_59 = arith.constant dense<0.000000e+00> : vector<2x128xf32>
    %228 = tpu.matmul %227, %19, %cst_59 {dimension_numbers = #tpu.dot_dimension_numbers<[1], [0], [0], [1], [0, 0, 1, 1], [], []>} : vector<2x128xbf16>, vector<128x128xbf16>, vector<2x128xf32> -> vector<2x128xf32>
    %229 = arith.addf %226, %228 : vector<2x128xf32>
    %230 = arith.truncf %214 : vector<2x128xf32> to vector<2x128xbf16>
    %cst_60 = arith.constant dense<0.000000e+00> : vector<2x128xf32>
    %231 = tpu.matmul %230, %20, %cst_60 {dimension_numbers = #tpu.dot_dimension_numbers<[1], [0], [0], [1], [0, 0, 1, 1], [], []>} : vector<2x128xbf16>, vector<128x128xbf16>, vector<2x128xf32> -> vector<2x128xf32>
    %232 = vector.broadcast %22 : vector<1x128xf32> to vector<2x128xf32>
    %233 = arith.addf %231, %232 : vector<2x128xf32>
    %234 = arith.truncf %225 : vector<2x128xf32> to vector<2x128xbf16>
    %cst_61 = arith.constant dense<0.000000e+00> : vector<2x128xf32>
    %235 = tpu.matmul %234, %21, %cst_61 {dimension_numbers = #tpu.dot_dimension_numbers<[1], [0], [0], [1], [0, 0, 1, 1], [], []>} : vector<2x128xbf16>, vector<128x128xbf16>, vector<2x128xf32> -> vector<2x128xf32>
    %236 = arith.addf %233, %235 : vector<2x128xf32>
    %237 = arith.mulf %229, %8 : vector<2x128xf32>
    %238 = math.tanh %237 : vector<2x128xf32>
    %239 = arith.mulf %8, %238 : vector<2x128xf32>
    %240 = arith.addf %239, %11 : vector<2x128xf32>
    %c64_i32_62 = arith.constant 64 : i32
    %241 = tpu.dynamic_rotate %240 by %c64_i32_62 dim 1 : vector<2x128xf32>, i32 -> vector<2x128xf32>
    %242 = arith.mulf %240, %241 : vector<2x128xf32>
    %c32_i32_63 = arith.constant 32 : i32
    %243 = tpu.dynamic_rotate %242 by %c32_i32_63 dim 1 : vector<2x128xf32>, i32 -> vector<2x128xf32>
    %244 = arith.mulf %241, %212 : vector<2x128xf32>
    %245 = arith.addf %244, %243 : vector<2x128xf32>
    %246 = math.tanh %245 : vector<2x128xf32>
    %247 = arith.mulf %240, %246 : vector<2x128xf32>
    %248 = arith.mulf %236, %8 : vector<2x128xf32>
    %249 = math.tanh %248 : vector<2x128xf32>
    %250 = arith.mulf %8, %249 : vector<2x128xf32>
    %251 = arith.addf %250, %11 : vector<2x128xf32>
    %c64_i32_64 = arith.constant 64 : i32
    %252 = tpu.dynamic_rotate %251 by %c64_i32_64 dim 1 : vector<2x128xf32>, i32 -> vector<2x128xf32>
    %253 = arith.mulf %251, %252 : vector<2x128xf32>
    %c32_i32_65 = arith.constant 32 : i32
    %254 = tpu.dynamic_rotate %253 by %c32_i32_65 dim 1 : vector<2x128xf32>, i32 -> vector<2x128xf32>
    %255 = arith.mulf %252, %223 : vector<2x128xf32>
    %256 = arith.addf %255, %254 : vector<2x128xf32>
    %257 = math.tanh %256 : vector<2x128xf32>
    %258 = arith.mulf %251, %257 : vector<2x128xf32>
    %259 = arith.truncf %247 : vector<2x128xf32> to vector<2x128xbf16>
    %cst_66 = arith.constant dense<0.000000e+00> : vector<2x128xf32>
    %260 = tpu.matmul %259, %20, %cst_66 {dimension_numbers = #tpu.dot_dimension_numbers<[1], [0], [0], [1], [0, 0, 1, 1], [], []>} : vector<2x128xbf16>, vector<128x128xbf16>, vector<2x128xf32> -> vector<2x128xf32>
    %261 = vector.broadcast %22 : vector<1x128xf32> to vector<2x128xf32>
    %262 = arith.addf %260, %261 : vector<2x128xf32>
    %263 = arith.truncf %258 : vector<2x128xf32> to vector<2x128xbf16>
    %cst_67 = arith.constant dense<0.000000e+00> : vector<2x128xf32>
    %264 = tpu.matmul %263, %21, %cst_67 {dimension_numbers = #tpu.dot_dimension_numbers<[1], [0], [0], [1], [0, 0, 1, 1], [], []>} : vector<2x128xbf16>, vector<128x128xbf16>, vector<2x128xf32> -> vector<2x128xf32>
    %265 = arith.addf %262, %264 : vector<2x128xf32>
    %266 = arith.mulf %265, %8 : vector<2x128xf32>
    %267 = math.tanh %266 : vector<2x128xf32>
    %268 = arith.mulf %8, %267 : vector<2x128xf32>
    %269 = arith.addf %268, %11 : vector<2x128xf32>
    %c64_i32_68 = arith.constant 64 : i32
    %270 = tpu.dynamic_rotate %269 by %c64_i32_68 dim 1 : vector<2x128xf32>, i32 -> vector<2x128xf32>
    %271 = arith.mulf %269, %270 : vector<2x128xf32>
    %c32_i32_69 = arith.constant 32 : i32
    %272 = tpu.dynamic_rotate %271 by %c32_i32_69 dim 1 : vector<2x128xf32>, i32 -> vector<2x128xf32>
    %273 = arith.mulf %270, %256 : vector<2x128xf32>
    %274 = arith.addf %273, %272 : vector<2x128xf32>
    %275 = math.tanh %274 : vector<2x128xf32>
    %276 = arith.mulf %269, %275 : vector<2x128xf32>
    %277 = arith.truncf %276 : vector<2x128xf32> to vector<2x128xbf16>
    %c0_70 = arith.constant 0 : index
    %c0_71 = arith.constant 0 : index
    %278 = vector.load %arg7[%c0_70, %c0_71] : memref<128x8xbf16, #tpu.memory_space<vmem>>, vector<128x8xbf16>
    %cst_72 = arith.constant dense<0.000000e+00> : vector<2x8xf32>
    %279 = tpu.matmul %277, %278, %cst_72 {dimension_numbers = #tpu.dot_dimension_numbers<[1], [0], [0], [1], [0, 0, 1, 1], [], []>} : vector<2x128xbf16>, vector<128x8xbf16>, vector<2x8xf32> -> vector<2x8xf32>
    %c0_73 = arith.constant 0 : index
    %c0_74 = arith.constant 0 : index
    %280 = vector.load %arg8[%c0_73, %c0_74] : memref<1x8xf32, #tpu.memory_space<vmem>>, vector<1x8xf32>
    %281 = vector.broadcast %280 : vector<1x8xf32> to vector<2x8xf32>
    %282 = arith.addf %279, %281 : vector<2x8xf32>
    %c0_75 = arith.constant 0 : index
    %c0_76 = arith.constant 0 : index
    %283 = vector.load %arg9[%c0_75, %c0_76] : memref<2x8xf32, #tpu.memory_space<vmem>>, vector<2x8xf32>
    tpu.vector_store %arg9[%c0_75, %c0_76], %282 {strides = array<i32>} : memref<2x8xf32, #tpu.memory_space<vmem>>, vector<2x8xf32>,
    return
  }
}

</mosaic_0001>

<bundles_post_ra>
// kernel: lstm_model_forward.1
= control target key start
LH: loop header
LB: loop body
LE: loop exit
PB: predicated region body
PF: predicated region fallthrough
CT: control target
= control target key end

     0   :  { %14 = vsyncpa [#allocation3], 0  ;;  %s1864_s0 = inlined_call_operand.vmem [shape: f32[16,16], index: 0, kind: input, shape index: {}]   ;;  %s1865_s1 = inlined_call_operand.vmem [shape: bf16[16,128], index: 1, kind: input, shape index: {}]   ;;  %s1866_s2 = inlined_call_operand.vmem [shape: bf16[128,128], index: 2, kind: input, shape index: {}]   ;;  %s1867_s3 = inlined_call_operand.vmem [shape: f32[1,128], index: 3, kind: input, shape index: {}]   ;;  %s1868_s4 = inlined_call_operand.hbm [shape: bf16[128,128], index: 4, kind: input, shape index: {}]   ;;  %s1869_s5 = inlined_call_operand.hbm [shape: bf16[128,128], index: 5, kind: input, shape index: {}]   ;;  %s1870_s6 = inlined_call_operand.vmem [shape: f32[1,128], index: 6, kind: input, shape index: {}]   ;;  %s1871_s7 = inlined_call_operand.vmem [shape: bf16[128,8], index: 7, kind: input, shape index: {}]   ;;  %s1872_s8 = inlined_call_operand.vmem [shape: f32[1,8], index: 8, kind: input, shape index: {}]   ;;  %s1873_s9 = inlined_call_operand.hbm [shape: f32[2,8], index: 9, kind: output, shape index: {}]  }
   0x1   :  { %15 = vsyncpa [#allocation6], 0 }
   0x2   :  { %16 = vsyncpa [#allocation4], 0  ;;  %s29_s11 = sshll.u32 %s1868_s4, 4  ;;  %s1349_s12 = smov [#allocation2]   ;;  %s30_s11 = int_to_ptr.hbm [resolvable:$true] %s29_s11 }
   0x3   :  { %s31_s13 = sshll.u32 %s1349_s12, 4  ;;  %s42_s16 = sshll.u32 %s1869_s5, 4  ;;  %s32_s13 = int_to_ptr.vmem [resolvable:$true] %s31_s13  ;;  %s43_s16 = int_to_ptr.hbm [resolvable:$true] %s42_s16 }
   0x4   :  { %s1350_s17 = smov 64   ;;  %s1351_s18 = smov 4  }
   0x5   :  { %37 = dma.hbm_to_vmem [thread:$0]  %s30_s11, 1024, %s32_s13, [#allocation3], %s1350_s17, %s1350_s17, %s1351_s18  }
   0x6   :  { %s1352_s19 = smov [#allocation5]  }
   0x7   :  { %s44_s20 = sshll.u32 %s1352_s19, 4  ;;  %s45_s20 = int_to_ptr.vmem [resolvable:$true] %s44_s20 }
   0x8   :  { %50 = dma.hbm_to_vmem [thread:$0]  %s43_s16, 1024, %s45_s20, [#allocation6], %s1350_s17, %s1350_s17, %s1351_s18  }
   0x9   :  { %1343 = dma.done.wait [#allocation3], 1024  }
   0xa   :  { %1344 = vsyncadd [#allocation3], 4294966272 }
   0xb   :  { %1345 = dma.done.wait [#allocation6], 1024  }
   0xc   :  { %1346 = vsyncadd [#allocation6], 4294966272  ;;  %v1164_v0 = vld [vmem:[%s1865_s1] sm:$0xff]  ;;  %v74_v2 = vld [vmem:[%s1864_s0 + $0x8] sm:$0xff]  ;;  %vm88_vm0 = vcmask 130048   ;;  %v66_v4 = vlaneseq  ;;  %v1353_v7 = vmov 0.5  }
   0xd   :  { %v73_v1 = vld [vmem:[%s1864_s0] sm:$0xff]  ;;  %99 = vmatpush.bf16.msra.mxu0 %v1164_v0  ;;  %v1448_v16 = vld [vmem:[%s1866_s2 + $0x38] sm:$0xff]  ;;  %v1457_v18 = vld [vmem:[%s1866_s2 + $0x30] sm:$0xff]  ;;  %s1354_s13 = smov 32   ;;  %s1355_s12 = smov [#allocation7]   ;;  %vm1011_vm4 = vcmask 58368  }
   0xe   :  { %v75_v3 = vpack.c.bf16 %v74_v2, %v73_v1  ;;  %v67_v5 = vand.u32 127, %v66_v4  ;;  %v1428_v6 = vld [vmem:[%s1867_s3] ss:$0 sm:$0xff]  ;;  %v1450_v17 = vld [vmem:[#allocation2 + $0x38] sm:$0xff]  ;;  %215 = vmatpush.bf16.msra.mxu1 %v1448_v16  ;;  %v1459_v19 = vld [vmem:[#allocation2 + $0x30] sm:$0xff]  ;;  %336 = vmatpush.bf16.msra.mxu3 %v1448_v16  ;;  %s1020_s16 = sshll.u32 %s1873_s9, 4  ;;  %s1021_s16 = int_to_ptr.hbm [resolvable:$true] %s1020_s16 }
   0xf   :  { %283 = vmatpush.bf16.msra.mxu2 %v1450_v17  ;;  %v1468_v20 = vld [vmem:[%s1866_s2 + $0x28] sm:$0xff]  ;;  %v1479_v22 = vld [vmem:[%s1866_s2 + $0x20] sm:$0xff]  ;;  %v1490_v24 = vld [vmem:[%s1866_s2 + $0x18] sm:$0xff] }
  0x10   :  { %1035 = vmatmul.msk.bf16.vlgmr.msra.gmra.mxu0 %vm88_vm0, %v75_v3  ;;  %vm68_vm1 = vcmp.ge.s32.totalorder %v67_v5, 64  ;;  %vm69_vm2 = vcmp.lt.s32.totalorder %v67_v5, 96  ;;  %v1470_v21 = vld [vmem:[#allocation2 + $0x28] sm:$0xff]  ;;  %v1481_v23 = vld [vmem:[#allocation2 + $0x20] sm:$0xff]  ;;  %v1492_v25 = vld [vmem:[#allocation2 + $0x18] sm:$0xff] }
  0x11   :  { %vm70_vm3 = vmand %vm68_vm1, %vm69_vm2  ;;  %353 = vmatpush.bf16.msrb.mxu0 %v1450_v17  ;;  %v1505_v28 = vld [vmem:[%s1866_s2 + $0x10] sm:$0xff]  ;;  %v1514_v30 = vld [vmem:[%s1866_s2 + $0x8] sm:$0xff] }
  0x12   :  { %v1430_v8 = vsel %vm70_vm3, 1.0, %v1353_v7  ;;  %v1437_v13 = vsel %vm70_vm3, 0.0, %v1353_v7  ;;  %216 = vmatpush.bf16.msra.mxu1 %v1457_v18  ;;  %337 = vmatpush.bf16.msra.mxu3 %v1457_v18  ;;  %v1507_v29 = vld [vmem:[#allocation2 + $0x10] sm:$0xff]  ;;  %v1516_v31 = vld [vmem:[#allocation2 + $0x8] sm:$0xff]  ;;  %v1525_v32 = vld [vmem:[%s1866_s2] sm:$0xff] }
  0x13   :  { %284 = vmatpush.bf16.msra.mxu2 %v1459_v19  ;;  %v1527_v33 = vld [vmem:[#allocation2] sm:$0xff]  ;;  %v1581_v55 = vld [vmem:[#allocation5 + $0x38] sm:$0xff]  ;;  %v1584_v56 = vld [vmem:[#allocation5 + $0x30] sm:$0xff] }
  0x14   :  { %v1567_v41 = vld [vmem:[%s1870_s6] ss:$0 sm:$0xff]  ;;  %v1589_v59 = vld [vmem:[#allocation5 + $0x28] sm:$0xff]  ;;  %v1597_v61 = vld [vmem:[#allocation5 + $0x18] sm:$0xff] }
  0x15   :  { %354 = vmatpush.bf16.msrb.mxu0 %v1459_v19  ;;  %v1593_v60 = vld [vmem:[#allocation5 + $0x20] sm:$0xff]  ;;  %v1604_v2 = vld [vmem:[#allocation5 + $0x10] sm:$0xff]  ;;  %v1607_v3 = vld [vmem:[#allocation5 + $0x8] sm:$0xff] }
  0x16   :  { %217 = vmatpush.bf16.msra.mxu1 %v1468_v20  ;;  %338 = vmatpush.bf16.msra.mxu3 %v1468_v20  ;;  %v1611_v4 = vld [vmem:[#allocation5] sm:$0xff] }
  0x17   :  { %285 = vmatpush.bf16.msra.mxu2 %v1470_v21 }
  0x19   :  { %355 = vmatpush.bf16.msrb.mxu0 %v1470_v21 }
  0x1a   :  { %218 = vmatpush.bf16.msra.mxu1 %v1479_v22  ;;  %339 = vmatpush.bf16.msra.mxu3 %v1479_v22 }
  0x1b   :  { %286 = vmatpush.bf16.msra.mxu2 %v1481_v23 }
  0x1d   :  { %356 = vmatpush.bf16.msrb.mxu0 %v1481_v23 }
  0x1e   :  { %219 = vmatpush.bf16.msra.mxu1 %v1490_v24  ;;  %340 = vmatpush.bf16.msra.mxu3 %v1490_v24 }
  0x1f   :  { %287 = vmatpush.bf16.msra.mxu2 %v1492_v25 }
  0x21   :  { %357 = vmatpush.bf16.msrb.mxu0 %v1492_v25 }
  0x22   :  { %220 = vmatpush.bf16.msra.mxu1 %v1505_v28  ;;  %341 = vmatpush.bf16.msra.mxu3 %v1505_v28 }
  0x23   :  { %288 = vmatpush.bf16.msra.mxu2 %v1507_v29 }
  0x25   :  { %358 = vmatpush.bf16.msrb.mxu0 %v1507_v29 }
  0x26   :  { %221 = vmatpush.bf16.msra.mxu1 %v1514_v30  ;;  %342 = vmatpush.bf16.msra.mxu3 %v1514_v30 }
  0x27   :  { %289 = vmatpush.bf16.msra.mxu2 %v1516_v31 }
  0x29   :  { %359 = vmatpush.bf16.msrb.mxu0 %v1516_v31 }
  0x2a   :  { %222 = vmatpush.bf16.msra.mxu1 %v1525_v32  ;;  %343 = vmatpush.bf16.msra.mxu3 %v1525_v32 }
  0x2b   :  { %290 = vmatpush.bf16.msra.mxu2 %v1527_v33 }
  0x2d   :  { %360 = vmatpush.bf16.msrb.mxu0 %v1527_v33 }
  0x2e   :  { %488 = vmatpush.bf16.msrb.mxu3 %v1450_v17  ;;  %415 = vmatpush.bf16.msrb.mxu1 %v1581_v55 }
  0x2f   :  { %471 = vmatpush.bf16.msrb.mxu2 %v1448_v16 }
  0x31   :  { %502 = vmatpush.bf16.msra.mxu0 %v1581_v55 }
  0x32   :  { %489 = vmatpush.bf16.msrb.mxu3 %v1459_v19  ;;  %416 = vmatpush.bf16.msrb.mxu1 %v1584_v56 }
  0x33   :  { %472 = vmatpush.bf16.msrb.mxu2 %v1457_v18 }
  0x35   :  { %503 = vmatpush.bf16.msra.mxu0 %v1584_v56 }
  0x36   :  { %490 = vmatpush.bf16.msrb.mxu3 %v1470_v21  ;;  %417 = vmatpush.bf16.msrb.mxu1 %v1589_v59 }
  0x37   :  { %473 = vmatpush.bf16.msrb.mxu2 %v1468_v20 }
  0x39   :  { %504 = vmatpush.bf16.msra.mxu0 %v1589_v59 }
  0x3a   :  { %491 = vmatpush.bf16.msrb.mxu3 %v1481_v23  ;;  %418 = vmatpush.bf16.msrb.mxu1 %v1593_v60 }
  0x3b   :  { %474 = vmatpush.bf16.msrb.mxu2 %v1479_v22 }
  0x3d   :  { %505 = vmatpush.bf16.msra.mxu0 %v1593_v60 }
  0x3e   :  { %492 = vmatpush.bf16.msrb.mxu3 %v1492_v25  ;;  %419 = vmatpush.bf16.msrb.mxu1 %v1597_v61 }
  0x3f   :  { %475 = vmatpush.bf16.msrb.mxu2 %v1490_v24 }
  0x41   :  { %506 = vmatpush.bf16.msra.mxu0 %v1597_v61 }
  0x42   :  { %493 = vmatpush.bf16.msrb.mxu3 %v1507_v29  ;;  %420 = vmatpush.bf16.msrb.mxu1 %v1604_v2 }
  0x43   :  { %476 = vmatpush.bf16.msrb.mxu2 %v1505_v28 }
  0x45   :  { %507 = vmatpush.bf16.msra.mxu0 %v1604_v2 }
  0x46   :  { %494 = vmatpush.bf16.msrb.mxu3 %v1516_v31  ;;  %421 = vmatpush.bf16.msrb.mxu1 %v1607_v3 }
  0x47   :  { %477 = vmatpush.bf16.msrb.mxu2 %v1514_v30 }
  0x49   :  { %508 = vmatpush.bf16.msra.mxu0 %v1607_v3 }
  0x4a   :  { %495 = vmatpush.bf16.msrb.mxu3 %v1527_v33  ;;  %422 = vmatpush.bf16.msrb.mxu1 %v1611_v4 }
  0x4b   :  { %478 = vmatpush.bf16.msrb.mxu2 %v1525_v32 }
  0x4d   :  { %509 = vmatpush.bf16.msra.mxu0 %v1611_v4 }
  0x8d   :  { %v101_v9 = vpop.f32.mrf.mxu0 }
  0x8e   :  { %v1433_v10 = vadd.f32 %v1428_v6, %v101_v9 }
  0x90   :  { %v155_v11 = vmul.f32 %v1433_v10, %v1430_v8 }
  0x92   :  { %1207 = vtanh.f32 %v155_v11 }
  0x98   :  { %v1208_v12 = vpop.eup %1207 }
  0x99   :  { %v157_v14 = vmul.f32 %v1208_v12, %v1430_v8 }
  0x9b   :  { %v1441_v15 = vadd.f32 %v157_v14, %v1437_v13 }
  0x9d   :  { %159 = vrot.lane.b32.xlu0 %v1441_v15, %s1350_s17 }
 0x10f   :  { %v160_v26 = vpop.permute.xlu0 %159 }
 0x110   :  { %v161_v27 = vmul.f32 %v160_v26, %v1441_v15 }
 0x112   :  { %162 = vrot.lane.b32.xlu0 %v161_v27, %s1354_s13 }
 0x184   :  { %v1547_v34 = vpop.permute.xlu0 %162 }
 0x185   :  { %1209 = vtanh.f32 %v1547_v34 }
 0x18b   :  { %v1210_v35 = vpop.eup %1209 }
 0x18c   :  { %v165_v36 = vmul.f32 %v1210_v35, %v1441_v15 }
 0x18e   :  { %v166_v37 = vpack.c.bf16 %v165_v36, %v165_v36 }
 0x190   :  { %223 = vmatmul.bf16.vlgmr.msra.gmra.mxu1 %v166_v37  ;;  %291 = vmatmul.bf16.vlgmr.msra.gmra.mxu2 %v166_v37 }
 0x191   :  { %572 = vmatpush.bf16.msra.mxu2 %v1450_v17  ;;  %558 = vmatpush.bf16.msra.mxu1 %v1448_v16 }
 0x195   :  { %573 = vmatpush.bf16.msra.mxu2 %v1459_v19  ;;  %559 = vmatpush.bf16.msra.mxu1 %v1457_v18 }
 0x199   :  { %574 = vmatpush.bf16.msra.mxu2 %v1470_v21  ;;  %560 = vmatpush.bf16.msra.mxu1 %v1468_v20 }
 0x19d   :  { %575 = vmatpush.bf16.msra.mxu2 %v1481_v23  ;;  %561 = vmatpush.bf16.msra.mxu1 %v1479_v22 }
 0x1a1   :  { %576 = vmatpush.bf16.msra.mxu2 %v1492_v25  ;;  %562 = vmatpush.bf16.msra.mxu1 %v1490_v24 }
 0x1a5   :  { %577 = vmatpush.bf16.msra.mxu2 %v1507_v29  ;;  %563 = vmatpush.bf16.msra.mxu1 %v1505_v28 }
 0x1a9   :  { %578 = vmatpush.bf16.msra.mxu2 %v1516_v31  ;;  %564 = vmatpush.bf16.msra.mxu1 %v1514_v30 }
 0x1ad   :  { %579 = vmatpush.bf16.msra.mxu2 %v1527_v33  ;;  %565 = vmatpush.bf16.msra.mxu1 %v1525_v32 }
 0x20d   :  { %v224_v38 = vpop.f32.mrf.mxu1 }
 0x20e   :  { %v229_v39 = vrot.slane %v224_v38, 6 }
 0x210   :  { %v231_v40 = vadd.f32 %v229_v39, %v1433_v10  ;;  %v1656_v39 = vpop.f32.mrf.mxu0 }
 0x212   :  { %v296_v42 = vmul.f32 %v231_v40, %v1430_v8 }
 0x213   :  { %v292_v43 = vpop.f32.mrf.mxu2 }
 0x214   :  { %1211 = vtanh.f32 %v296_v42  ;;  %v293_v44 = vadd.f32 %v1567_v41, %v292_v43 }
 0x215   :  { %v226_v45 = vpop.f32.mrf.mxu1 }
 0x216   :  { %v321_v46 = vmul.f32 %v293_v44, %v1430_v8 }
 0x218   :  { %1213 = vtanh.f32 %v321_v46 }
 0x21a   :  { %v1212_v47 = vpop.eup %1211 }
 0x21b   :  { %v294_v48 = vpop.f32.mrf.mxu2  ;;  %v298_v49 = vmul.f32 %v1212_v47, %v1430_v8 }
 0x21d   :  { %v1574_v50 = vadd.f32 %v298_v49, %v1437_v13 }
 0x21e   :  { %v1214_v51 = vpop.eup %1213 }
 0x21f   :  { %v301_v52 = vrot.slane %v1574_v50, 2  ;;  %v323_v53 = vmul.f32 %v1214_v51, %v1430_v8 }
 0x221   :  { %303 = vrot.lane.b32.xlu1 %v301_v52, %s1350_s17  ;;  %v324_v54 = vadd.f32 %v323_v53, %v1437_v13 }
 0x223   :  { %325 = vrot.lane.b32.xlu2 %v324_v54, %s1350_s17 }
 0x27d   :  { %v326_v57 = vpop.permute.xlu2 %325 }
 0x27e   :  { %v327_v58 = vmul.f32 %v326_v57, %v324_v54 }
 0x280   :  { %328 = vrot.lane.b32.xlu2 %v327_v58, %s1354_s13 }
 0x293   :  { %v304_v62 = vpop.permute.xlu1 %303 }
 0x294   :  { %v306_v63 = vrot.slane %v304_v62, 6  ;;  %v314_v12 = vmul.f32 %v304_v62, %v1547_v34 }
 0x296   :  { %v308_v0 = vmul.f32 %v306_v63, %v1574_v50 }
 0x298   :  { %v310_v1 = vrot.slane %v308_v0, 2 }
 0x29a   :  { %312 = vrot.lane.b32.xlu1 %v310_v1, %s1354_s13 }
 0x2da   :  { %v1622_v5 = vpop.permute.xlu2 %328 }
 0x2db   :  { %1215 = vtanh.f32 %v1622_v5 }
 0x2e1   :  { %v1216_v7 = vpop.eup %1215 }
 0x2e2   :  { %v331_v9 = vmul.f32 %v1216_v7, %v324_v54 }
 0x2e4   :  { %v366_v11 = vpack.c.bf16 %v331_v9, %v331_v9 }
 0x2e6   :  { %423 = vmatmul.bf16.vlgmr.msrb.gmra.mxu1 %v366_v11 }
 0x2e7   :  { %644 = vmatpush.bf16.msrb.mxu1 %v1450_v17 }
 0x2eb   :  { %645 = vmatpush.bf16.msrb.mxu1 %v1459_v19 }
 0x2ef   :  { %646 = vmatpush.bf16.msrb.mxu1 %v1470_v21 }
 0x2f3   :  { %647 = vmatpush.bf16.msrb.mxu1 %v1481_v23 }
 0x2f7   :  { %648 = vmatpush.bf16.msrb.mxu1 %v1492_v25 }
 0x2fb   :  { %649 = vmatpush.bf16.msrb.mxu1 %v1507_v29 }
 0x2ff   :  { %650 = vmatpush.bf16.msrb.mxu1 %v1516_v31 }
 0x303   :  { %651 = vmatpush.bf16.msrb.mxu1 %v1527_v33 }
 0x30c   :  { %v313_v14 = vpop.permute.xlu1 %312 }
 0x30d   :  { %v1636_v15 = vadd.f32 %v314_v12, %v313_v14 }
 0x30f   :  { %1217 = vtanh.f32 %v1636_v15 }
 0x315   :  { %v1218_v26 = vpop.eup %1217 }
 0x316   :  { %v318_v27 = vrot.slane %v1218_v26, 6 }
 0x318   :  { %v320_v35 = vmul.f32 %v318_v27, %v1574_v50 }
 0x31a   :  { %v332_v36 = vpack.c.bf16 %v320_v35, %v320_v35 }
 0x31c   :  { %v334_v37 = vrot.slane %v332_v36, 1 }
 0x31e   :  { %344 = vmatmul.bf16.vlgmr.msra.gmra.mxu3 %v334_v37  ;;  %361 = vmatmul.bf16.vlgmr.msrb.gmra.mxu0 %v334_v37 }
 0x31f   :  { %586 = vmatpush.bf16.msra.mxu3 %v1581_v55  ;;  %627 = vmatpush.bf16.msrb.mxu0 %v1448_v16 }
 0x323   :  { %587 = vmatpush.bf16.msra.mxu3 %v1584_v56  ;;  %628 = vmatpush.bf16.msrb.mxu0 %v1457_v18 }
 0x327   :  { %588 = vmatpush.bf16.msra.mxu3 %v1589_v59  ;;  %629 = vmatpush.bf16.msrb.mxu0 %v1468_v20 }
 0x32b   :  { %589 = vmatpush.bf16.msra.mxu3 %v1593_v60  ;;  %630 = vmatpush.bf16.msrb.mxu0 %v1479_v22 }
 0x32f   :  { %590 = vmatpush.bf16.msra.mxu3 %v1597_v61  ;;  %631 = vmatpush.bf16.msrb.mxu0 %v1490_v24 }
 0x333   :  { %591 = vmatpush.bf16.msra.mxu3 %v1604_v2  ;;  %632 = vmatpush.bf16.msrb.mxu0 %v1505_v28 }
 0x337   :  { %592 = vmatpush.bf16.msra.mxu3 %v1607_v3  ;;  %633 = vmatpush.bf16.msrb.mxu0 %v1514_v30 }
 0x33b   :  { %593 = vmatpush.bf16.msra.mxu3 %v1611_v4  ;;  %634 = vmatpush.bf16.msrb.mxu0 %v1525_v32 }
 0x363   :  { %v424_v34 = vpop.f32.mrf.mxu1 }
 0x36b   :  { %v426_v38 = vpop.f32.mrf.mxu1 }
 0x39b   :  { %v362_v40 = vpop.f32.mrf.mxu0 }
 0x39c   :  { %v363_v42 = vadd.f32 %v1567_v41, %v362_v40 }
 0x39e   :  { %v428_v43 = vadd.f32 %v424_v34, %v363_v42 }
 0x3a0   :  { %v454_v44 = vmul.f32 %v428_v43, %v1430_v8 }
 0x3a1   :  { %v345_v45 = vpop.f32.mrf.mxu3 }
 0x3a2   :  { %1219 = vtanh.f32 %v454_v44  ;;  %v350_v46 = vrot.slane %v345_v45, 4 }
 0x3a3   :  { %v364_v47 = vpop.f32.mrf.mxu0 }
 0x3a4   :  { %v352_v48 = vadd.f32 %v350_v46, %v1433_v10 }
 0x3a6   :  { %v429_v49 = vmul.f32 %v352_v48, %v1430_v8 }
 0x3a8   :  { %v1220_v50 = vpop.eup %1219  ;;  %1221 = vtanh.f32 %v429_v49 }
 0x3a9   :  { %v347_v51 = vpop.f32.mrf.mxu3  ;;  %v456_v52 = vmul.f32 %v1220_v50, %v1430_v8 }
 0x3ab   :  { %v457_v53 = vadd.f32 %v456_v52, %v1437_v13 }
 0x3ad   :  { %458 = vrot.lane.b32.xlu2 %v457_v53, %s1350_s17 }
 0x3ae   :  { %v1222_v54 = vpop.eup %1221 }
 0x3af   :  { %v431_v57 = vmul.f32 %v1222_v54, %v1430_v8 }
 0x3b1   :  { %v432_v58 = vadd.f32 %v431_v57, %v1437_v13 }
 0x3b3   :  { %v434_v62 = vrot.slane %v432_v58, 4 }
 0x3b5   :  { %436 = vrot.lane.b32.xlu0 %v434_v62, %s1350_s17 }
 0x407   :  { %v459_v63 = vpop.permute.xlu2 %458 }
 0x408   :  { %v460_v0 = vmul.f32 %v459_v63, %v457_v53  ;;  %v463_v12 = vmul.f32 %v459_v63, %v1622_v5 }
 0x40a   :  { %461 = vrot.lane.b32.xlu0 %v460_v0, %s1354_s13 }
 0x427   :  { %v437_v1 = vpop.permute.xlu0 %436 }
 0x428   :  { %v439_v7 = vrot.slane %v437_v1, 4  ;;  %v447_v5 = vmul.f32 %v437_v1, %v1636_v15 }
 0x42a   :  { %v441_v9 = vmul.f32 %v439_v7, %v432_v58 }
 0x42c   :  { %v443_v11 = vrot.slane %v441_v9, 4 }
 0x42e   :  { %445 = vrot.lane.b32.xlu1 %v443_v11, %s1354_s13 }
 0x47c   :  { %v462_v14 = vpop.permute.xlu0 %461 }
 0x47d   :  { %v1671_v26 = vadd.f32 %v463_v12, %v462_v14 }
 0x47f   :  { %1223 = vtanh.f32 %v1671_v26 }
 0x485   :  { %v1224_v27 = vpop.eup %1223 }
 0x486   :  { %v466_v35 = vmul.f32 %v1224_v27, %v457_v53 }
 0x488   :  { %v501_v36 = vpack.c.bf16 %v466_v35, %v466_v35 }
 0x48a   :  { %510 = vmatmul.bf16.vlgmr.msra.gmra.mxu0 %v501_v36 }
 0x48b   :  { %731 = vmatpush.bf16.msra.mxu0 %v1450_v17 }
 0x48f   :  { %732 = vmatpush.bf16.msra.mxu0 %v1459_v19 }
 0x493   :  { %733 = vmatpush.bf16.msra.mxu0 %v1470_v21 }
 0x497   :  { %734 = vmatpush.bf16.msra.mxu0 %v1481_v23 }
 0x49b   :  { %735 = vmatpush.bf16.msra.mxu0 %v1492_v25 }
 0x49f   :  { %736 = vmatpush.bf16.msra.mxu0 %v1507_v29 }
 0x4a0   :  { %v446_v37 = vpop.permute.xlu1 %445 }
 0x4a1   :  { %v1681_v34 = vadd.f32 %v447_v5, %v446_v37 }
 0x4a3   :  { %1225 = vtanh.f32 %v1681_v34  ;;  %737 = vmatpush.bf16.msra.mxu0 %v1516_v31 }
 0x4a7   :  { %738 = vmatpush.bf16.msra.mxu0 %v1527_v33 }
 0x4a9   :  { %v1226_v38 = vpop.eup %1225 }
 0x4aa   :  { %v451_v40 = vrot.slane %v1226_v38, 4 }
 0x4ac   :  { %v453_v42 = vmul.f32 %v451_v40, %v432_v58 }
 0x4ae   :  { %v467_v43 = vpack.c.bf16 %v453_v42, %v453_v42 }
 0x4b0   :  { %v469_v44 = vrot.slane %v467_v43, 2 }
 0x4b2   :  { %479 = vmatmul.bf16.vlgmr.msrb.gmra.mxu2 %v469_v44  ;;  %496 = vmatmul.bf16.vlgmr.msrb.gmra.mxu3 %v469_v44 }
 0x4b3   :  { %658 = vmatpush.bf16.msrb.mxu2 %v1581_v55  ;;  %714 = vmatpush.bf16.msrb.mxu3 %v1448_v16 }
 0x4b7   :  { %659 = vmatpush.bf16.msrb.mxu2 %v1584_v56  ;;  %715 = vmatpush.bf16.msrb.mxu3 %v1457_v18 }
 0x4bb   :  { %660 = vmatpush.bf16.msrb.mxu2 %v1589_v59  ;;  %716 = vmatpush.bf16.msrb.mxu3 %v1468_v20 }
 0x4bf   :  { %661 = vmatpush.bf16.msrb.mxu2 %v1593_v60  ;;  %717 = vmatpush.bf16.msrb.mxu3 %v1479_v22 }
 0x4c3   :  { %662 = vmatpush.bf16.msrb.mxu2 %v1597_v61  ;;  %718 = vmatpush.bf16.msrb.mxu3 %v1490_v24 }
 0x4c7   :  { %663 = vmatpush.bf16.msrb.mxu2 %v1604_v2  ;;  %719 = vmatpush.bf16.msrb.mxu3 %v1505_v28 }
 0x4cb   :  { %664 = vmatpush.bf16.msrb.mxu2 %v1607_v3  ;;  %720 = vmatpush.bf16.msrb.mxu3 %v1514_v30 }
 0x4cf   :  { %665 = vmatpush.bf16.msrb.mxu2 %v1611_v4  ;;  %721 = vmatpush.bf16.msrb.mxu3 %v1525_v32 }
 0x507   :  { %v511_v15 = vpop.f32.mrf.mxu0 }
 0x50f   :  { %v513_v45 = vpop.f32.mrf.mxu0 }
 0x535   :  { %v480_v46 = vpop.f32.mrf.mxu2  ;;  %v497_v47 = vpop.f32.mrf.mxu3 }
 0x536   :  { %v485_v48 = vrot.slane %v480_v46, 2  ;;  %v498_v49 = vadd.f32 %v1567_v41, %v497_v47 }
 0x538   :  { %v487_v50 = vadd.f32 %v485_v48, %v1433_v10  ;;  %v515_v51 = vadd.f32 %v511_v15, %v498_v49 }
 0x53a   :  { %v516_v52 = vmul.f32 %v487_v50, %v1430_v8  ;;  %v541_v53 = vmul.f32 %v515_v51, %v1430_v8 }
 0x53c   :  { %1227 = vtanh.f32 %v516_v52 }
 0x53d   :  { %1229 = vtanh.f32 %v541_v53  ;;  %v482_v54 = vpop.f32.mrf.mxu2  ;;  %v499_v57 = vpop.f32.mrf.mxu3 }
 0x542   :  { %v1228_v58 = vpop.eup %1227 }
 0x543   :  { %v1230_v62 = vpop.eup %1229  ;;  %v518_v63 = vmul.f32 %v1228_v58, %v1430_v8 }
 0x544   :  { %v543_v0 = vmul.f32 %v1230_v62, %v1430_v8 }
 0x545   :  { %v519_v1 = vadd.f32 %v518_v63, %v1437_v13 }
 0x546   :  { %v544_v7 = vadd.f32 %v543_v0, %v1437_v13 }
 0x547   :  { %v521_v10 = vrot.slane %v519_v1, 6 }
 0x548   :  { %545 = vrot.lane.b32.xlu2 %v544_v7, %s1350_s17 }
 0x549   :  { %523 = vrot.lane.b32.xlu1 %v521_v10, %s1350_s17 }
 0x5a2   :  { %v546_v9 = vpop.permute.xlu2 %545 }
 0x5a3   :  { %v547_v11 = vmul.f32 %v546_v9, %v544_v7  ;;  %v550_v36 = vmul.f32 %v546_v9, %v1671_v26 }
 0x5a5   :  { %548 = vrot.lane.b32.xlu1 %v547_v11, %s1354_s13 }
 0x5bb   :  { %v524_v12 = vpop.permute.xlu1 %523 }
 0x5bc   :  { %v526_v14 = vrot.slane %v524_v12, 2  ;;  %v534_v43 = vmul.f32 %v524_v12, %v1681_v34 }
 0x5be   :  { %v528_v27 = vmul.f32 %v526_v14, %v519_v1 }
 0x5c0   :  { %v530_v35 = vrot.slane %v528_v27, 6 }
 0x5c2   :  { %532 = vrot.lane.b32.xlu0 %v530_v35, %s1354_s13 }
 0x617   :  { %v549_v5 = vpop.permute.xlu1 %548 }
 0x618   :  { %v1715_v37 = vadd.f32 %v550_v36, %v549_v5 }
 0x61a   :  { %1231 = vtanh.f32 %v1715_v37 }
 0x620   :  { %v1232_v38 = vpop.eup %1231 }
 0x621   :  { %v553_v40 = vmul.f32 %v1232_v38, %v544_v7 }
 0x623   :  { %v585_v42 = vpack.c.bf16 %v553_v40, %v553_v40 }
 0x625   :  { %594 = vmatmul.bf16.vlgmr.msra.gmra.mxu3 %v585_v42 }
 0x626   :  { %818 = vmatpush.bf16.msra.mxu3 %v1450_v17 }
 0x62a   :  { %819 = vmatpush.bf16.msra.mxu3 %v1459_v19 }
 0x62e   :  { %820 = vmatpush.bf16.msra.mxu3 %v1470_v21 }
 0x632   :  { %821 = vmatpush.bf16.msra.mxu3 %v1481_v23 }
 0x634   :  { %v533_v26 = vpop.permute.xlu0 %532 }
 0x635   :  { %v535_v44 = vadd.f32 %v534_v43, %v533_v26 }
 0x636   :  { %822 = vmatpush.bf16.msra.mxu3 %v1492_v25 }
 0x637   :  { %1233 = vtanh.f32 %v535_v44 }
 0x63a   :  { %823 = vmatpush.bf16.msra.mxu3 %v1507_v29 }
 0x63d   :  { %v1234_v15 = vpop.eup %1233 }
 0x63e   :  { %v538_v45 = vrot.slane %v1234_v15, 2  ;;  %824 = vmatpush.bf16.msra.mxu3 %v1516_v31 }
 0x640   :  { %v540_v46 = vmul.f32 %v538_v45, %v519_v1 }
 0x642   :  { %v554_v47 = vpack.c.bf16 %v540_v46, %v540_v46  ;;  %825 = vmatpush.bf16.msra.mxu3 %v1527_v33 }
 0x644   :  { %v556_v48 = vrot.slane %v554_v47, 3 }
 0x646   :  { %566 = vmatmul.bf16.vlgmr.msra.gmra.mxu1 %v556_v48  ;;  %580 = vmatmul.bf16.vlgmr.msra.gmra.mxu2 %v556_v48 }
 0x647   :  { %745 = vmatpush.bf16.msra.mxu1 %v1581_v55  ;;  %801 = vmatpush.bf16.msra.mxu2 %v1448_v16 }
 0x64b   :  { %746 = vmatpush.bf16.msra.mxu1 %v1584_v56  ;;  %802 = vmatpush.bf16.msra.mxu2 %v1457_v18 }
 0x64f   :  { %747 = vmatpush.bf16.msra.mxu1 %v1589_v59  ;;  %803 = vmatpush.bf16.msra.mxu2 %v1468_v20  ;;  %v1745_v20 = vadd.f32 %v1428_v6, %v1656_v39 }
 0x653   :  { %748 = vmatpush.bf16.msra.mxu1 %v1593_v60  ;;  %804 = vmatpush.bf16.msra.mxu2 %v1479_v22 }
 0x657   :  { %749 = vmatpush.bf16.msra.mxu1 %v1597_v61  ;;  %805 = vmatpush.bf16.msra.mxu2 %v1490_v24 }
 0x65b   :  { %750 = vmatpush.bf16.msra.mxu1 %v1604_v2  ;;  %806 = vmatpush.bf16.msra.mxu2 %v1505_v28 }
 0x65f   :  { %751 = vmatpush.bf16.msra.mxu1 %v1607_v3  ;;  %807 = vmatpush.bf16.msra.mxu2 %v1514_v30 }
 0x663   :  { %752 = vmatpush.bf16.msra.mxu1 %v1611_v4  ;;  %808 = vmatpush.bf16.msra.mxu2 %v1525_v32 }
 0x6a8   :  { %v595_v16 = vpop.f32.mrf.mxu3 }
 0x6b0   :  { %v597_v18 = vpop.f32.mrf.mxu3 }
 0x6c3   :  { %v567_v22 = vpop.f32.mrf.mxu1 }
 0x6c4   :  { %v571_v24 = vadd.f32 %v567_v22, %v1745_v20 }
 0x6c6   :  { %v600_v34 = vmul.f32 %v571_v24, %v1430_v8 }
 0x6c8   :  { %1235 = vtanh.f32 %v600_v34 }
 0x6c9   :  { %v581_v28 = vpop.f32.mrf.mxu2 }
 0x6ca   :  { %v582_v49 = vadd.f32 %v1567_v41, %v581_v28 }
 0x6cb   :  { %v569_v30 = vpop.f32.mrf.mxu1 }
 0x6cc   :  { %v599_v50 = vadd.f32 %v595_v16, %v582_v49 }
 0x6ce   :  { %v1236_v51 = vpop.eup %1235  ;;  %v613_v32 = vmul.f32 %v599_v50, %v1430_v8 }
 0x6cf   :  { %v602_v52 = vmul.f32 %v1236_v51, %v1430_v8 }
 0x6d0   :  { %1237 = vtanh.f32 %v613_v32 }
 0x6d1   :  { %v583_v53 = vpop.f32.mrf.mxu2  ;;  %v603_v6 = vadd.f32 %v602_v52, %v1437_v13 }
 0x6d3   :  { %604 = vrot.lane.b32.xlu2 %v603_v6, %s1350_s17 }
 0x6d6   :  { %v1238_v39 = vpop.eup %1237 }
 0x6d7   :  { %v615_v54 = vmul.f32 %v1238_v39, %v1430_v8 }
 0x6d9   :  { %v616_v57 = vadd.f32 %v615_v54, %v1437_v13 }
 0x6db   :  { %617 = vrot.lane.b32.xlu0 %v616_v57, %s1350_s17 }
 0x72d   :  { %v605_v58 = vpop.permute.xlu2 %604 }
 0x72e   :  { %v606_v62 = vmul.f32 %v605_v58, %v603_v6  ;;  %v609_v1 = vmul.f32 %v605_v58, %v535_v44 }
 0x730   :  { %607 = vrot.lane.b32.xlu1 %v606_v62, %s1354_s13 }
 0x74d   :  { %v618_v63 = vpop.permute.xlu0 %617 }
 0x74e   :  { %v619_v0 = vmul.f32 %v618_v63, %v616_v57  ;;  %v622_v9 = vmul.f32 %v618_v63, %v1715_v37 }
 0x750   :  { %620 = vrot.lane.b32.xlu2 %v619_v0, %s1354_s13 }
 0x7a2   :  { %v608_v7 = vpop.permute.xlu1 %607 }
 0x7a3   :  { %v1759_v10 = vadd.f32 %v609_v1, %v608_v7 }
 0x7a5   :  { %1239 = vtanh.f32 %v1759_v10 }
 0x7aa   :  { %v621_v11 = vpop.permute.xlu2 %620 }
 0x7ab   :  { %v1240_v12 = vpop.eup %1239  ;;  %v1763_v14 = vadd.f32 %v622_v9, %v621_v11 }
 0x7ac   :  { %v612_v27 = vmul.f32 %v1240_v12, %v603_v6 }
 0x7ad   :  { %1241 = vtanh.f32 %v1763_v14 }
 0x7ae   :  { %v626_v35 = vpack.c.bf16 %v612_v27, %v612_v27 }
 0x7b0   :  { %635 = vmatmul.bf16.vlgmr.msrb.gmra.mxu0 %v626_v35  ;;  %652 = vmatmul.bf16.vlgmr.msrb.gmra.mxu1 %v626_v35 }
 0x7b1   :  { %832 = vmatpush.bf16.msrb.mxu0 %v1581_v55  ;;  %888 = vmatpush.bf16.msrb.mxu1 %v1450_v17 }
 0x7b3   :  { %v1242_v36 = vpop.eup %1241 }
 0x7b4   :  { %v625_v5 = vmul.f32 %v1242_v36, %v616_v57 }
 0x7b5   :  { %833 = vmatpush.bf16.msrb.mxu0 %v1584_v56  ;;  %889 = vmatpush.bf16.msrb.mxu1 %v1459_v19 }
 0x7b6   :  { %v657_v37 = vpack.c.bf16 %v625_v5, %v625_v5 }
 0x7b8   :  { %666 = vmatmul.bf16.vlgmr.msrb.gmra.mxu2 %v657_v37 }
 0x7b9   :  { %834 = vmatpush.bf16.msrb.mxu0 %v1589_v59  ;;  %902 = vmatpush.bf16.msrb.mxu2 %v1581_v55 }
 0x7ba   :  { %890 = vmatpush.bf16.msrb.mxu1 %v1470_v21 }
 0x7bd   :  { %835 = vmatpush.bf16.msrb.mxu0 %v1593_v60  ;;  %903 = vmatpush.bf16.msrb.mxu2 %v1584_v56 }
 0x7be   :  { %891 = vmatpush.bf16.msrb.mxu1 %v1481_v23 }
 0x7c1   :  { %836 = vmatpush.bf16.msrb.mxu0 %v1597_v61  ;;  %904 = vmatpush.bf16.msrb.mxu2 %v1589_v59 }
 0x7c2   :  { %892 = vmatpush.bf16.msrb.mxu1 %v1492_v25 }
 0x7c5   :  { %837 = vmatpush.bf16.msrb.mxu0 %v1604_v2  ;;  %905 = vmatpush.bf16.msrb.mxu2 %v1593_v60 }
 0x7c6   :  { %893 = vmatpush.bf16.msrb.mxu1 %v1507_v29 }
 0x7c9   :  { %838 = vmatpush.bf16.msrb.mxu0 %v1607_v3  ;;  %906 = vmatpush.bf16.msrb.mxu2 %v1597_v61 }
 0x7ca   :  { %894 = vmatpush.bf16.msrb.mxu1 %v1516_v31 }
 0x7cd   :  { %839 = vmatpush.bf16.msrb.mxu0 %v1611_v4  ;;  %907 = vmatpush.bf16.msrb.mxu2 %v1604_v2 }
 0x7ce   :  { %895 = vmatpush.bf16.msrb.mxu1 %v1527_v33 }
 0x7d1   :  { %908 = vmatpush.bf16.msrb.mxu2 %v1607_v3 }
 0x7d5   :  { %909 = vmatpush.bf16.msrb.mxu2 %v1611_v4 }
 0x82d   :  { %v636_v17 = vpop.f32.mrf.mxu0  ;;  %v653_v19 = vpop.f32.mrf.mxu1 }
 0x82e   :  { %v641_v21 = vrot.slane %v636_v17, 6  ;;  %v654_v56 = vadd.f32 %v1567_v41, %v653_v19 }
 0x830   :  { %v643_v23 = vadd.f32 %v641_v21, %v1745_v20 }
 0x832   :  { %v672_v25 = vmul.f32 %v643_v23, %v1430_v8 }
 0x834   :  { %1243 = vtanh.f32 %v672_v25 }
 0x835   :  { %v638_v29 = vpop.f32.mrf.mxu0  ;;  %v655_v31 = vpop.f32.mrf.mxu1 }
 0x83a   :  { %v1244_v55 = vpop.eup %1243 }
 0x83b   :  { %v667_v59 = vpop.f32.mrf.mxu2  ;;  %v674_v33 = vmul.f32 %v1244_v55, %v1430_v8 }
 0x83c   :  { %v671_v60 = vadd.f32 %v667_v59, %v654_v56 }
 0x83d   :  { %v675_v61 = vadd.f32 %v674_v33, %v1437_v13 }
 0x83e   :  { %v697_v2 = vmul.f32 %v671_v60, %v1430_v8 }
 0x83f   :  { %v677_v3 = vrot.slane %v675_v61, 2 }
 0x840   :  { %1245 = vtanh.f32 %v697_v2 }
 0x841   :  { %679 = vrot.lane.b32.xlu0 %v677_v3, %s1350_s17 }
 0x843   :  { %v669_v4 = vpop.f32.mrf.mxu2 }
 0x846   :  { %v1246_v38 = vpop.eup %1245 }
 0x847   :  { %v699_v40 = vmul.f32 %v1246_v38, %v1430_v8 }
 0x849   :  { %v700_v42 = vadd.f32 %v699_v40, %v1437_v13 }
 0x84b   :  { %701 = vrot.lane.b32.xlu1 %v700_v42, %s1350_s17 }
 0x8b3   :  { %v680_v43 = vpop.permute.xlu0 %679 }
 0x8b4   :  { %v682_v26 = vrot.slane %v680_v43, 6  ;;  %v690_v47 = vmul.f32 %v680_v43, %v1759_v10 }
 0x8b6   :  { %v684_v44 = vmul.f32 %v682_v26, %v675_v61 }
 0x8b8   :  { %v686_v15 = vrot.slane %v684_v44, 2 }
 0x8ba   :  { %688 = vrot.lane.b32.xlu2 %v686_v15, %s1354_s13 }
 0x8bd   :  { %v702_v45 = vpop.permute.xlu1 %701 }
 0x8be   :  { %v703_v46 = vmul.f32 %v702_v45, %v700_v42  ;;  %v706_v49 = vmul.f32 %v702_v45, %v1763_v14 }
 0x8c0   :  { %704 = vrot.lane.b32.xlu0 %v703_v46, %s1354_s13 }
 0x914   :  { %v689_v48 = vpop.permute.xlu2 %688 }
 0x915   :  { %v691_v16 = vadd.f32 %v690_v47, %v689_v48 }
 0x917   :  { %1247 = vtanh.f32 %v691_v16 }
 0x91d   :  { %v1248_v18 = vpop.eup %1247 }
 0x91e   :  { %v694_v22 = vrot.slane %v1248_v18, 6 }
 0x920   :  { %v696_v24 = vmul.f32 %v694_v22, %v675_v61 }
 0x922   :  { %v710_v34 = vpack.c.bf16 %v696_v24, %v696_v24 }
 0x924   :  { %v712_v28 = vrot.slane %v710_v34, 1 }
 0x926   :  { %722 = vmatmul.bf16.vlgmr.msrb.gmra.mxu3 %v712_v28  ;;  %739 = vmatmul.bf16.vlgmr.msra.gmra.mxu0 %v712_v28 }
 0x932   :  { %v705_v30 = vpop.permute.xlu0 %704 }
 0x933   :  { %v707_v50 = vadd.f32 %v706_v49, %v705_v30 }
 0x935   :  { %1249 = vtanh.f32 %v707_v50 }
 0x93b   :  { %v1250_v51 = vpop.eup %1249 }
 0x93c   :  { %v709_v32 = vmul.f32 %v1250_v51, %v700_v42 }
 0x93e   :  { %v744_v52 = vpack.c.bf16 %v709_v32, %v709_v32 }
 0x940   :  { %753 = vmatmul.bf16.vlgmr.msra.gmra.mxu1 %v744_v52 }
 0x9a3   :  { %v740_v53 = vpop.f32.mrf.mxu0 }
 0x9a4   :  { %v741_v10 = vadd.f32 %v1567_v41, %v740_v53 }
 0x9a9   :  { %v723_v6 = vpop.f32.mrf.mxu3 }
 0x9aa   :  { %v728_v39 = vrot.slane %v723_v6, 4 }
 0x9ab   :  { %v742_v54 = vpop.f32.mrf.mxu0 }
 0x9ac   :  { %v730_v57 = vadd.f32 %v728_v39, %v1745_v20 }
 0x9ae   :  { %v759_v58 = vmul.f32 %v730_v57, %v1430_v8 }
 0x9b0   :  { %1251 = vtanh.f32 %v759_v58 }
 0x9b1   :  { %v725_v62 = vpop.f32.mrf.mxu3 }
 0x9b6   :  { %v1252_v63 = vpop.eup %1251 }
 0x9b7   :  { %v761_v0 = vmul.f32 %v1252_v63, %v1430_v8 }
 0x9b9   :  { %v762_v1 = vadd.f32 %v761_v0, %v1437_v13 }
 0x9bb   :  { %v764_v7 = vrot.slane %v762_v1, 4 }
 0x9bd   :  { %766 = vrot.lane.b32.xlu1 %v764_v7, %s1350_s17  ;;  %v754_v9 = vpop.f32.mrf.mxu1 }
 0x9be   :  { %v758_v11 = vadd.f32 %v754_v9, %v741_v10 }
 0x9c0   :  { %v784_v12 = vmul.f32 %v758_v11, %v1430_v8 }
 0x9c2   :  { %1253 = vtanh.f32 %v784_v12 }
 0x9c5   :  { %v756_v14 = vpop.f32.mrf.mxu1 }
 0x9c8   :  { %v1254_v27 = vpop.eup %1253 }
 0x9c9   :  { %v786_v35 = vmul.f32 %v1254_v27, %v1430_v8 }
 0x9cb   :  { %v787_v36 = vadd.f32 %v786_v35, %v1437_v13 }
 0x9cd   :  { %788 = vrot.lane.b32.xlu2 %v787_v36, %s1350_s17 }
 0xa27   :  { %v789_v5 = vpop.permute.xlu2 %788 }
 0xa28   :  { %v790_v37 = vmul.f32 %v789_v5, %v787_v36  ;;  %v793_v25 = vmul.f32 %v789_v5, %v707_v50 }
 0xa2a   :  { %791 = vrot.lane.b32.xlu1 %v790_v37, %s1354_s13 }
 0xa2f   :  { %v767_v17 = vpop.permute.xlu1 %766 }
 0xa30   :  { %v769_v19 = vrot.slane %v767_v17, 4  ;;  %v777_v59 = vmul.f32 %v767_v17, %v691_v16 }
 0xa32   :  { %v771_v21 = vmul.f32 %v769_v19, %v762_v1 }
 0xa34   :  { %v773_v23 = vrot.slane %v771_v21, 4 }
 0xa36   :  { %775 = vrot.lane.b32.xlu0 %v773_v23, %s1354_s13 }
 0xa9c   :  { %v792_v29 = vpop.permute.xlu1 %791 }
 0xa9d   :  { %v794_v31 = vadd.f32 %v793_v25, %v792_v29 }
 0xa9f   :  { %1255 = vtanh.f32 %v794_v31 }
 0xaa5   :  { %v1256_v55 = vpop.eup %1255 }
 0xaa6   :  { %v796_v56 = vmul.f32 %v1256_v55, %v787_v36  ;;  %v1194_v55 = vld [vmem:[%s1871_s7 + $0x28] sm:$0xff] }
 0xaa8   :  { %v776_v33 = vpop.permute.xlu0 %775  ;;  %v831_v60 = vpack.c.bf16 %v796_v56, %v796_v56 }
 0xaa9   :  { %v778_v61 = vadd.f32 %v777_v59, %v776_v33  ;;  %v1191_v33 = vld [vmem:[%s1871_s7 + $0x10] sm:$0xff] }
 0xaaa   :  { %840 = vmatmul.bf16.vlgmr.msrb.gmra.mxu0 %v831_v60  ;;  %v1190_v60 = vld [vmem:[%s1871_s7 + $0x8] sm:$0xff] }
 0xaab   :  { %1257 = vtanh.f32 %v778_v61 }
 0xab1   :  { %v1258_v2 = vpop.eup %1257 }
 0xab2   :  { %v781_v3 = vrot.slane %v1258_v2, 4 }
 0xab4   :  { %v783_v4 = vmul.f32 %v781_v3, %v762_v1 }
 0xab6   :  { %v797_v38 = vpack.c.bf16 %v783_v4, %v783_v4 }
 0xab8   :  { %v799_v40 = vrot.slane %v797_v38, 2 }
 0xaba   :  { %809 = vmatmul.bf16.vlgmr.msra.gmra.mxu2 %v799_v40  ;;  %826 = vmatmul.bf16.vlgmr.msra.gmra.mxu3 %v799_v40 }
 0xb27   :  { %v841_v42 = vpop.f32.mrf.mxu0 }
 0xb2f   :  { %v843_v43 = vpop.f32.mrf.mxu0 }
 0xb30   :  { %v1206_v43 = vld [vmem:[%s1872_s8] ss:$0 sm:$0xff] }
 0xb3d   :  { %v810_v26 = vpop.f32.mrf.mxu2  ;;  %v827_v44 = vpop.f32.mrf.mxu3 }
 0xb3e   :  { %v815_v15 = vrot.slane %v810_v26, 2  ;;  %v828_v45 = vadd.f32 %v1567_v41, %v827_v44 }
 0xb40   :  { %v817_v46 = vadd.f32 %v815_v15, %v1745_v20  ;;  %v845_v47 = vadd.f32 %v841_v42, %v828_v45 }
 0xb42   :  { %v846_v48 = vmul.f32 %v817_v46, %v1430_v8  ;;  %v871_v16 = vmul.f32 %v845_v47, %v1430_v8 }
 0xb44   :  { %1259 = vtanh.f32 %v846_v48 }
 0xb45   :  { %1261 = vtanh.f32 %v871_v16  ;;  %v812_v18 = vpop.f32.mrf.mxu2  ;;  %v829_v22 = vpop.f32.mrf.mxu3 }
 0xb4a   :  { %v1260_v24 = vpop.eup %1259 }
 0xb4b   :  { %v1262_v34 = vpop.eup %1261  ;;  %v848_v28 = vmul.f32 %v1260_v24, %v1430_v8 }
 0xb4c   :  { %v873_v49 = vmul.f32 %v1262_v34, %v1430_v8 }
 0xb4d   :  { %v849_v30 = vadd.f32 %v848_v28, %v1437_v13 }
 0xb4e   :  { %v874_v50 = vadd.f32 %v873_v49, %v1437_v13 }
 0xb4f   :  { %v851_v20 = vrot.slane %v849_v30, 6 }
 0xb50   :  { %875 = vrot.lane.b32.xlu0 %v874_v50, %s1350_s17 }
 0xb51   :  { %853 = vrot.lane.b32.xlu2 %v851_v20, %s1350_s17 }
 0xbab   :  { %v854_v51 = vpop.permute.xlu2 %853 }
 0xbac   :  { %v856_v32 = vrot.slane %v854_v51, 2  ;;  %v864_v62 = vmul.f32 %v854_v51, %v778_v61  ;;  %v1189_v61 = vld [vmem:[%s1871_s7] sm:$0xff] }
 0xbae   :  { %v858_v52 = vmul.f32 %v856_v32, %v849_v30 }
 0xbb0   :  { %v860_v53 = vrot.slane %v858_v52, 6 }
 0xbb2   :  { %862 = vrot.lane.b32.xlu1 %v860_v53, %s1354_s13 }
 0xbc2   :  { %v876_v6 = vpop.permute.xlu0 %875 }
 0xbc3   :  { %v877_v39 = vmul.f32 %v876_v6, %v874_v50  ;;  %v880_v54 = vmul.f32 %v876_v6, %v794_v31  ;;  %v1196_v31 = vld [vmem:[%s1871_s7 + $0x38] sm:$0xff] }
 0xbc4   :  { %998 = vmatpush.bf16.msrb.mxu3 %v1196_v31 }
 0xbc5   :  { %878 = vrot.lane.b32.xlu2 %v877_v39, %s1354_s13 }
 0xc1f   :  { %v879_v57 = vpop.permute.xlu2 %878 }
 0xc20   :  { %v881_v58 = vadd.f32 %v880_v54, %v879_v57 }
 0xc22   :  { %1263 = vtanh.f32 %v881_v58 }
 0xc24   :  { %v863_v63 = vpop.permute.xlu1 %862 }
 0xc25   :  { %v865_v0 = vadd.f32 %v864_v62, %v863_v63 }
 0xc27   :  { %1265 = vtanh.f32 %v865_v0 }
 0xc28   :  { %v1264_v1 = vpop.eup %1263 }
 0xc29   :  { %v883_v7 = vmul.f32 %v1264_v1, %v874_v50 }
 0xc2b   :  { %v901_v10 = vpack.c.bf16 %v883_v7, %v883_v7 }
 0xc2d   :  { %v1266_v9 = vpop.eup %1265  ;;  %910 = vmatmul.bf16.vlgmr.msrb.gmra.mxu2 %v901_v10 }
 0xc2e   :  { %v868_v11 = vrot.slane %v1266_v9, 2 }
 0xc30   :  { %v870_v12 = vmul.f32 %v868_v11, %v849_v30 }
 0xc32   :  { %v884_v14 = vpack.c.bf16 %v870_v12, %v870_v12 }
 0xc34   :  { %v886_v27 = vrot.slane %v884_v14, 3 }
 0xc36   :  { %896 = vmatmul.bf16.vlgmr.msrb.gmra.mxu1 %v886_v27 }
 0xcb0   :  { %v911_v35 = vpop.f32.mrf.mxu2 }
 0xcb3   :  { %v897_v36 = vpop.f32.mrf.mxu1 }
 0xcb4   :  { %v898_v5 = vadd.f32 %v1567_v41, %v897_v36  ;;  %v1195_v41 = vld [vmem:[%s1871_s7 + $0x30] sm:$0xff] }
 0xcb5   :  { %999 = vmatpush.bf16.msrb.mxu3 %v1195_v41 }
 0xcb6   :  { %v915_v37 = vadd.f32 %v911_v35, %v898_v5 }
 0xcb8   :  { %v916_v17 = vmul.f32 %v915_v37, %v1430_v8  ;;  %v913_v19 = vpop.f32.mrf.mxu2 }
 0xcb9   :  { %1000 = vmatpush.bf16.msrb.mxu3 %v1194_v55 }
 0xcba   :  { %1267 = vtanh.f32 %v916_v17 }
 0xcbb   :  { %v899_v21 = vpop.f32.mrf.mxu1 }
 0xcc0   :  { %v1268_v23 = vpop.eup %1267 }
 0xcc1   :  { %v918_v25 = vmul.f32 %v1268_v23, %v1430_v8  ;;  %v1193_v8 = vld [vmem:[%s1871_s7 + $0x20] sm:$0xff] }
 0xcc2   :  { %1001 = vmatpush.bf16.msrb.mxu3 %v1193_v8 }
 0xcc3   :  { %v919_v29 = vadd.f32 %v918_v25, %v1437_v13  ;;  %v1192_v13 = vld [vmem:[%s1871_s7 + $0x18] sm:$0xff] }
 0xcc5   :  { %920 = vrot.lane.b32.xlu0 %v919_v29, %s1350_s17 }
 0xcc6   :  { %1002 = vmatpush.bf16.msrb.mxu3 %v1192_v13 }
 0xcca   :  { %1003 = vmatpush.bf16.msrb.mxu3 %v1191_v33 }
 0xcce   :  { %1004 = vmatpush.bf16.msrb.mxu3 %v1190_v60 }
 0xcd2   :  { %1005 = vmatpush.bf16.msrb.mxu3 %v1189_v61 }
 0xd37   :  { %v921_v56 = vpop.permute.xlu0 %920 }
 0xd38   :  { %v922_v59 = vmul.f32 %v921_v56, %v919_v29  ;;  %v925_v2 = vmul.f32 %v921_v56, %v881_v58 }
 0xd3a   :  { %923 = vrot.lane.b32.xlu1 %v922_v59, %s1354_s13  ;;  %s1018_s13 = sshll.u32 %s1355_s12, 4  ;;  %s1019_s13 = int_to_ptr.vmem [resolvable:$true] %s1018_s13 }
 0xdac   :  { %v924_v3 = vpop.permute.xlu1 %923 }
 0xdad   :  { %v926_v4 = vadd.f32 %v925_v2, %v924_v3 }
 0xdaf   :  { %1269 = vtanh.f32 %v926_v4 }
 0xdb5   :  { %v1270_v38 = vpop.eup %1269 }
 0xdb6   :  { %v928_v40 = vmul.f32 %v1270_v38, %v919_v29 }
 0xdb8   :  { %v929_v42 = vpack.c.bf16 %v928_v40, %v928_v40 }
 0xdba   :  { %1006 = vmatmul.bf16.vlgmr.msrb.gmra.mxu3 %v929_v42 }
 0xe3d   :  { %v1007_v26 = vpop.f32.mrf.mxu3 }
 0xe3e   :  { %v1008_v44 = vadd.f32 %v1206_v43, %v1007_v26 }
 0xe40   :  { %1012 = vst.msk [vmem:[#allocation7] sm:$0x3] %vm1011_vm4, %v1008_v44 }
 0xe41   :  { %1023 = dma.vmem_to_hbm [thread:$0]  %s1019_s13, 32, %s1021_s16, [#allocation4]  }
 0xe45   :  { %v1009_v15 = vpop.f32.mrf.mxu3 }
 0xe46   :  { %1347 = dma.done.wait [#allocation4], 32  }
 0xe47   :  { %1348 = vsyncadd [#allocation4], 4294967264 }
 0xe48   :  { %1028 = vsyncpa [#allocation3], 1 }
 0xe49   :  { %1029 = vsyncpa [#allocation6], 1 }
 0xe4a   :  { %1030 = vsyncpa [#allocation4], 1 }

</bundles_post_ra>
